<compile_context>
chip_gen: v7x
topology: tpu7x:2x2x1
jax: 0.10.0
libtpu: 0.0.40
codegen_flags: <defaults>
</compile_context>

<pallas_src>
import math

import jax
import jax.numpy as jnp
import numpy as np
from jax.experimental import pallas as pl
from jax.experimental.pallas import tpu as pltpu

# ---------------- configuration (small shapes implied by the forward) ----------------
N_LAYERS = 2          # NVP coupling layers
FEAT = 16             # feature_dims
HID = 32              # hidden_size
PROJ = 8              # projection.proj_dims (projection = fixed bias-free linear 3->PROJ)
B, M, N = 2, 8, 32    # F: (B, M, FEAT), x: (B, N, M, 3)  -> 512 points
H2 = 2 * HID

# deterministic stand-in for torch.randperm-based "2 of 3" coupling masks
MASKS = [[1.0, 1.0, 0.0], [0.0, 1.0, 1.0], [1.0, 0.0, 1.0]]

HP = jax.lax.Precision.HIGHEST


# ---------------- shared tiny helpers (plain JAX, O(B*M) work) ----------------
def quaternions_to_rotation_matrices(q):
    w, x, y, z = q[..., 0], q[..., 1], q[..., 2], q[..., 3]
    n = w * w + x * x + y * y + z * z
    s = jnp.where(n != 0, 2.0 / jnp.where(n != 0, n, 1.0), 0.0)
    xx, yy, zz = s * x * x, s * y * y, s * z * z
    xy, xz, yz = s * x * y, s * x * z, s * y * z
    xw, yw, zw = s * x * w, s * y * w, s * z * w
    row0 = jnp.stack([1 - yy - zz, xy - zw, xz + yw], axis=-1)
    row1 = jnp.stack([xy + zw, 1 - xx - zz, yz - xw], axis=-1)
    row2 = jnp.stack([xz - yw, yz + xw, 1 - xx - yy], axis=-1)
    return jnp.stack([row0, row1, row2], axis=-2)


def small_head(Fm, p):
    h = jnp.maximum(Fm @ p['w1'] + p['b1'], 0.0)
    return h @ p['w2'] + p['b2']


def _pick_tile(npts):
    """Generation-specific tiling: v7x (2 TensorCores/chip) -> 2 lane-dense tiles
    so both cores get work; single-TC v5e/v6e -> a single grid step (each extra
    step costs ~0.35us, comparable to this kernel's entire compute)."""
    try:
        kind = jax.devices()[0].device_kind.lower()
    except Exception:  # pragma: no cover - defensive
        kind = ""
    if ("v7" in kind or "tpu7" in kind) and npts % 256 == 0 and (npts // 2) % 128 == 0:
        return npts // 2
    return npts


# ---------------- host-side weight packing (merged s|t branches, proj folded into W1) --------
def pack_layer_params(layers):
    """Pack per-layer weights channels-first.

    s and t MLPs are merged into one width-2*HID chain with block-diagonal W2
    and an 8-row W3 (s -> rows 0..2, t -> rows 4..6).  The fixed bias-free
    projection is folded into W1 (w1yp = W1[:, FEAT:] @ wp.T), and the
    y-independent W1[:, :FEAT] / b1 parts are returned separately so the
    wrapper can hoist them into the O(B*M) conditioning slab.
    Per-layer vec slab rows: [0:2H)=b2(s|t)  [2H:2H+8)=b3  [2H+8:2H+11)=mask  rest pad.
    """
    w1f, b1, w1yp, w2, w3, vec = [], [], [], [], [], []
    zhh = jnp.zeros((HID, HID), jnp.float32)
    wpT = layers[0]['wp'].T                                              # (PROJ, 3), shared
    for lp in layers:
        w1m = jnp.concatenate([lp['w1s'].T, lp['w1t'].T], axis=0)        # (2H, FEAT+PROJ)
        w1f.append(w1m[:, :FEAT])                                        # -> host pre slab
        b1.append(jnp.concatenate([lp['b1s'], lp['b1t']]))               # -> host pre slab
        w1yp.append(jnp.dot(w1m[:, FEAT:], wpT, precision=HP))           # (2H, 3) proj folded
        w2.append(jnp.concatenate(
            [jnp.concatenate([lp['w2s'].T, zhh], axis=1),
             jnp.concatenate([zhh, lp['w2t'].T], axis=1)], axis=0))      # (2H, 2H) block-diag
        w3m = jnp.zeros((8, H2), jnp.float32)
        w3m = w3m.at[0:3, :HID].set(lp['w3s'].T)                         # s -> rows 0..2
        w3m = w3m.at[4:7, HID:].set(lp['w3t'].T)                         # t -> rows 4..6
        w3.append(w3m)
        b3m = jnp.zeros((8,), jnp.float32)
        b3m = b3m.at[0:3].set(lp['b3s']).at[4:7].set(lp['b3t'])
        v = jnp.concatenate([lp['b2s'], lp['b2t'], b3m, lp['mask'],
                             jnp.zeros((5,), jnp.float32)])              # (2H+16,)
        vec.append(v.reshape(-1, 1))
    return (jnp.stack(w1yp), jnp.stack(w2), jnp.stack(w3), jnp.stack(vec),
            jnp.stack(w1f), jnp.stack(b1))


# ---------------- Pallas forward ----------------
def simple_nvp_forward_pallas(params, F, x, tile=None):
    Bb, Mm, feat_dim = F.shape
    _, Nn, _, D = x.shape
    assert D == 3
    BM = Bb * Mm
    npts = BM * Nn
    if tile is None:
        tile = _pick_tile(npts)
    assert npts % tile == 0 and tile % 128 == 0

    # tiny per-(b, m) heads stay in XLA (O(B*M) work, negligible)
    sigma = jax.nn.elu(small_head(F, params['scales'])) + 1.0            # (B, M, 3)
    q = small_head(F, params['rotations'])                               # (B, M, 4)
    q = q / jnp.sqrt(jnp.sum(q * q, axis=-1, keepdims=True))
    R = quaternions_to_rotation_matrices(q)                              # (B, M, 3, 3)
    t = small_head(F, params['translations'])                            # (B, M, 3)

    w1yp, w2T, w3T, vecT, w1fT, b1T = pack_layer_params(params['layers'])
    L = len(params['layers'])

    # y-independent feature path hoisted to O(B*M): pre[l] = W1f[l] @ F + b1[l]
    Fbm = F.astype(jnp.float32).reshape(BM, feat_dim).T                  # (FEAT, BM)
    pre = jnp.einsum('lhf,fm->lhm', w1fT, Fbm, precision=HP) + b1T[:, :, None]
    pre = pre.reshape(L * H2, BM)                                        # (L*2H, BM)

    # per-(b, m) affine rows: [0:3)=1/sigma  [3:6)=t  [6:15)=R row-major  [15]=pad
    aff = jnp.concatenate(
        [(1.0 / sigma).reshape(BM, 3), t.reshape(BM, 3),
         R.reshape(BM, 9), jnp.zeros((BM, 1), jnp.float32)], axis=-1).T  # (16, BM)

    cond_bm = jnp.concatenate([pre, aff], axis=0)                        # (L*2H+16, BM)
    rows = cond_bm.shape[0]
    # host pre-expansion to per-point columns (<=300 KiB total; streamed /
    # prefetched by the Pallas pipeline, never touches the in-kernel MXU)
    cond = jnp.repeat(cond_bm, Nn, axis=1)                               # (rows, npts)

    # points-major (b, m, n) ordering, channels-first: global column // N == b*M + m
    y0 = jnp.transpose(x.astype(jnp.float32), (3, 0, 2, 1)).reshape(3, npts)

    def kernel(cond_ref, w1yp_ref, w2_ref, w3_ref, vec_ref, y_ref, o_ref):
        y = y_ref[...]                                                   # (3, tile)
        for l in range(L):   # static unroll: all coupling layers fused, y stays resident
            bl = vec_ref[l]                                              # (2H+16, 1)
            m = bl[H2 + 8:H2 + 11]                                       # (3, 1) mask
            y1 = y * m
            # projection folded into W1: single dot on the y-path per layer
            h1 = jnp.maximum(
                cond_ref[l * H2:(l + 1) * H2, :]
                + jnp.dot(w1yp_ref[l], y1, preferred_element_type=jnp.float32), 0.0)
            h2 = jnp.maximum(
                jnp.dot(w2_ref[l], h1, preferred_element_type=jnp.float32)
                + bl[0:H2], 0.0)                                         # (2H, tile)
            st = jnp.dot(w3_ref[l], h2, preferred_element_type=jnp.float32) \
                + bl[H2:H2 + 8]                                          # (8, tile)
            s = jnp.clip(st[0:3], -10.0, 10.0)                           # Hardtanh(-10, 10)
            tt = st[4:7]
            y = y1 + (1.0 - m) * ((y - tt) * jnp.exp(-s))
            # note: ldj = (-s).sum(-1) is returned by CouplingLayer but unused in forward

        # fused normalize + explicit affine: out_j = sum_i (y_i / sigma_i) * R[i, j] + t_j
        affE = cond_ref[L * H2:L * H2 + 15, :]                           # (15, tile)
        yn = y * affE[0:3]
        out = affE[3:6]
        for i3 in range(3):
            out = out + yn[i3:i3 + 1] * affE[6 + 3 * i3:9 + 3 * i3]
        o_ref[...] = out

    def _const_spec(a):
        nd = a.ndim
        return pl.BlockSpec(a.shape, lambda i, _nd=nd: (0,) * _nd)

    weights = (w1yp, w2T, w3T, vecT)
    out = pl.pallas_call(
        kernel,
        out_shape=jax.ShapeDtypeStruct((3, npts), jnp.float32),
        grid=(npts // tile,),
        in_specs=[pl.BlockSpec((rows, tile), lambda i: (0, i))]
                 + [_const_spec(a) for a in weights]
                 + [pl.BlockSpec((3, tile), lambda i: (0, i))],
        out_specs=pl.BlockSpec((3, tile), lambda i: (0, i)),
        compiler_params=pltpu.CompilerParams(dimension_semantics=("parallel",)),
    )(cond, *weights, y0)

    # TODO(synk): if downstream code can consume channels-first (3, B, M, N),
    # drop this transpose (it is an HBM round trip comparable to the kernel).
    return jnp.transpose(out.reshape(3, Bb, Mm, Nn), (1, 3, 2, 0))


# ---------------- pure-JAX reference (mirrors the torch module math) ----------------
def simple_nvp_forward_ref(params, F, x):
    Bb, Mm, feat_dim = F.shape
    _, Nn, _, _ = x.shape
    sigma = jax.nn.elu(small_head(F, params['scales'])) + 1.0
    q = small_head(F, params['rotations'])
    q = q / jnp.sqrt(jnp.sum(q * q, axis=-1, keepdims=True))
    R = quaternions_to_rotation_matrices(q)
    t = small_head(F, params['translations'])

    feat_e = jnp.broadcast_to(F[:, None], (Bb, Nn, Mm, feat_dim))
    y = x.astype(jnp.float32)
    for lp in params['layers']:
        mask = lp['mask']
        y1 = y * mask
        proj = jnp.matmul(y1, lp['wp'], precision=HP)
        xin = jnp.concatenate([feat_e, proj], axis=-1)
        hs = jnp.maximum(jnp.matmul(xin, lp['w1s'], precision=HP) + lp['b1s'], 0.0)
        hs = jnp.maximum(jnp.matmul(hs, lp['w2s'], precision=HP) + lp['b2s'], 0.0)
        s = jnp.clip(jnp.matmul(hs, lp['w3s'], precision=HP) + lp['b3s'], -10.0, 10.0)
        ht = jnp.maximum(jnp.matmul(xin, lp['w1t'], precision=HP) + lp['b1t'], 0.0)
        ht = jnp.maximum(jnp.matmul(ht, lp['w2t'], precision=HP) + lp['b2t'], 0.0)
        tt = jnp.matmul(ht, lp['w3t'], precision=HP) + lp['b3t']
        y = y1 + (1.0 - mask) * ((y - tt) * jnp.exp(-s))
    y = y / sigma[:, None]
    y = jnp.einsum('bnmi,bmij->bnmj', y, R, precision=HP) + t[:, None]
    return y


# ---------------- deterministic parameter init ----------------
def linear_params(key, fan_in, fan_out):
    kw, kb = jax.random.split(key)
    bound = 1.0 / math.sqrt(fan_in)
    w = jax.random.uniform(kw, (fan_in, fan_out), jnp.float32, -bound, bound)
    b = jax.random.uniform(kb, (fan_out,), jnp.float32, -bound, bound)
    return w, b


def init_params(key):
    k_proj, k_layers, k_sc, k_rot, k_tr = jax.random.split(key, 5)
    # TODO(synk): the projection module is user-supplied in the original code;
    # here it is a fixed deterministic bias-free linear map 3 -> PROJ.
    wp = jax.random.normal(k_proj, (3, PROJ), jnp.float32) * 0.5
    layers = []
    for li, lk in enumerate(jax.random.split(k_layers, N_LAYERS)):
        sk = jax.random.split(lk, 6)
        w1s, b1s = linear_params(sk[0], FEAT + PROJ, HID)
        w2s, b2s = linear_params(sk[1], HID, HID)
        w3s, b3s = linear_params(sk[2], HID, 3)
        w1t, b1t = linear_params(sk[3], FEAT + PROJ, HID)
        w2t, b2t = linear_params(sk[4], HID, HID)
        w3t, b3t = linear_params(sk[5], HID, 3)
        layers.append(dict(
            mask=jnp.asarray(MASKS[li % len(MASKS)], jnp.float32), wp=wp,
            w1s=w1s, b1s=b1s, w2s=w2s, b2s=b2s, w3s=w3s, b3s=b3s,
            w1t=w1t, b1t=b1t, w2t=w2t, b2t=b2t, w3t=w3t, b3t=b3t))

    def head(k, out_dim):
        kk = jax.random.split(k, 2)
        w1, b1 = linear_params(kk[0], FEAT, HID)
        w2, b2 = linear_params(kk[1], HID, out_dim)
        return dict(w1=w1, b1=b1, w2=w2, b2=b2)

    return dict(layers=layers, scales=head(k_sc, 3),
                rotations=head(k_rot, 4), translations=head(k_tr, 3))


if __name__ == "__main__":
    key = jax.random.PRNGKey(0)
    kp, kF, kx = jax.random.split(key, 3)
    params = init_params(kp)
    F = jax.random.normal(kF, (B, M, FEAT), jnp.float32)
    x = jax.random.normal(kx, (B, N, M, 3), jnp.float32)

    fwd = jax.jit(simple_nvp_forward_pallas)
    out = jax.block_until_ready(fwd(params, F, x))

    ref = jax.block_until_ready(jax.jit(simple_nvp_forward_ref)(params, F, x))

    assert out.shape == (B, N, M, 3)
    np.testing.assert_allclose(np.asarray(out), np.asarray(ref), rtol=2e-4, atol=2e-4)
    print("KERNEL_OK")
</pallas_src>

<mosaic_0001>
module attributes {stable_mosaic.version = 11 : i64} {
  func.func @kernel(%arg0: i32, %arg1: memref<144x512xf32, #tpu.memory_space<vmem>>, %arg2: memref<2x64x3xf32, #tpu.memory_space<vmem>>, %arg3: memref<2x64x64xf32, #tpu.memory_space<vmem>>, %arg4: memref<2x8x64xf32, #tpu.memory_space<vmem>>, %arg5: memref<2x80x1xf32, #tpu.memory_space<vmem>>, %arg6: memref<3x512xf32, #tpu.memory_space<vmem>>, %arg7: memref<3x512xf32, #tpu.memory_space<vmem>>) attributes {dimension_semantics = [#tpu.dimension_semantics<parallel>], iteration_bounds = array<i64: 1>, scalar_prefetch = 0 : i64, scratch_operands = 0 : i64, tpu.core_type = #tpu.core_type<tc>, window_params = [{transform_indices = @transform_0, window_bounds = array<i64: 144, 512>}, {pipeline_mode = #tpu.pipeline_mode<synchronous>, transform_indices = @transform_1, window_bounds = array<i64: 2, 64, 3>}, {pipeline_mode = #tpu.pipeline_mode<synchronous>, transform_indices = @transform_2, window_bounds = array<i64: 2, 64, 64>}, {pipeline_mode = #tpu.pipeline_mode<synchronous>, transform_indices = @transform_3, window_bounds = array<i64: 2, 8, 64>}, {pipeline_mode = #tpu.pipeline_mode<synchronous>, transform_indices = @transform_4, window_bounds = array<i64: 2, 80, 1>}, {transform_indices = @transform_5, window_bounds = array<i64: 3, 512>}, {transform_indices = @transform_6, window_bounds = array<i64: 3, 512>}]} {
    %c0 = arith.constant 0 : index
    %c0_0 = arith.constant 0 : index
    %0 = vector.load %arg6[%c0, %c0_0] : memref<3x512xf32, #tpu.memory_space<vmem>>, vector<3x512xf32>
    %c0_1 = arith.constant 0 : index
    %c0_2 = arith.constant 0 : index
    %c0_3 = arith.constant 0 : index
    %1 = vector.load %arg5[%c0_1, %c0_2, %c0_3] : memref<2x80x1xf32, #tpu.memory_space<vmem>>, vector<1x80x1xf32>
    %2 = vector.shape_cast %1 : vector<1x80x1xf32> to vector<80x1xf32>
    %3 = vector.extract_strided_slice %2 {offsets = [72, 0], sizes = [3, 1], strides = [1, 1]} : vector<80x1xf32> to vector<3x1xf32>
    %4 = vector.broadcast %3 : vector<3x1xf32> to vector<3x512xf32>
    %5 = arith.mulf %0, %4 : vector<3x512xf32>
    %c0_4 = arith.constant 0 : index
    %c0_5 = arith.constant 0 : index
    %6 = vector.load %arg1[%c0_4, %c0_5] : memref<144x512xf32, #tpu.memory_space<vmem>>, vector<64x512xf32>
    %c0_6 = arith.constant 0 : index
    %c0_7 = arith.constant 0 : index
    %c0_8 = arith.constant 0 : index
    %7 = vector.load %arg2[%c0_6, %c0_7, %c0_8] : memref<2x64x3xf32, #tpu.memory_space<vmem>>, vector<1x64x3xf32>
    %8 = vector.shape_cast %7 : vector<1x64x3xf32> to vector<64x3xf32>
    %cst = arith.constant dense<0.000000e+00> : vector<64x512xf32>
    %9 = tpu.matmul %8, %5, %cst {dimension_numbers = #tpu.dot_dimension_numbers<[1], [0], [0], [1], [0, 0, 1, 1], [], []>} : vector<64x3xf32>, vector<3x512xf32>, vector<64x512xf32> -> vector<64x512xf32>
    %10 = arith.addf %6, %9 : vector<64x512xf32>
    %cst_9 = arith.constant 0.000000e+00 : f32
    %11 = vector.broadcast %cst_9 : f32 to vector<64x512xf32>
    %12 = arith.maximumf %10, %11 : vector<64x512xf32>
    %c0_10 = arith.constant 0 : index
    %c0_11 = arith.constant 0 : index
    %c0_12 = arith.constant 0 : index
    %13 = vector.load %arg3[%c0_10, %c0_11, %c0_12] : memref<2x64x64xf32, #tpu.memory_space<vmem>>, vector<1x64x64xf32>
    %14 = vector.shape_cast %13 : vector<1x64x64xf32> to vector<64x64xf32>
    %cst_13 = arith.constant dense<0.000000e+00> : vector<64x512xf32>
    %15 = tpu.matmul %14, %12, %cst_13 {dimension_numbers = #tpu.dot_dimension_numbers<[1], [0], [0], [1], [0, 0, 1, 1], [], []>} : vector<64x64xf32>, vector<64x512xf32>, vector<64x512xf32> -> vector<64x512xf32>
    %16 = vector.extract_strided_slice %2 {offsets = [0, 0], sizes = [64, 1], strides = [1, 1]} : vector<80x1xf32> to vector<64x1xf32>
    %17 = vector.broadcast %16 : vector<64x1xf32> to vector<64x512xf32>
    %18 = arith.addf %15, %17 : vector<64x512xf32>
    %cst_14 = arith.constant 0.000000e+00 : f32
    %19 = vector.broadcast %cst_14 : f32 to vector<64x512xf32>
    %20 = arith.maximumf %18, %19 : vector<64x512xf32>
    %c0_15 = arith.constant 0 : index
    %c0_16 = arith.constant 0 : index
    %c0_17 = arith.constant 0 : index
    %21 = vector.load %arg4[%c0_15, %c0_16, %c0_17] : memref<2x8x64xf32, #tpu.memory_space<vmem>>, vector<1x8x64xf32>
    %22 = vector.shape_cast %21 : vector<1x8x64xf32> to vector<8x64xf32>
    %cst_18 = arith.constant dense<0.000000e+00> : vector<8x512xf32>
    %23 = tpu.matmul %22, %20, %cst_18 {dimension_numbers = #tpu.dot_dimension_numbers<[1], [0], [0], [1], [0, 0, 1, 1], [], []>} : vector<8x64xf32>, vector<64x512xf32>, vector<8x512xf32> -> vector<8x512xf32>
    %24 = vector.extract_strided_slice %2 {offsets = [64, 0], sizes = [8, 1], strides = [1, 1]} : vector<80x1xf32> to vector<8x1xf32>
    %25 = vector.broadcast %24 : vector<8x1xf32> to vector<8x512xf32>
    %26 = arith.addf %23, %25 : vector<8x512xf32>
    %27 = vector.extract_strided_slice %26 {offsets = [0, 0], sizes = [3, 512], strides = [1, 1]} : vector<8x512xf32> to vector<3x512xf32>
    %cst_19 = arith.constant -1.000000e+01 : f32
    %cst_20 = arith.constant 1.000000e+01 : f32
    %28 = vector.broadcast %cst_19 : f32 to vector<3x512xf32>
    %29 = arith.maximumf %28, %27 : vector<3x512xf32>
    %30 = vector.broadcast %cst_20 : f32 to vector<3x512xf32>
    %31 = arith.minimumf %30, %29 : vector<3x512xf32>
    %32 = vector.extract_strided_slice %26 {offsets = [4, 0], sizes = [3, 512], strides = [1, 1]} : vector<8x512xf32> to vector<3x512xf32>
    %cst_21 = arith.constant 1.000000e+00 : f32
    %33 = vector.broadcast %cst_21 : f32 to vector<3x1xf32>
    %34 = arith.subf %33, %3 : vector<3x1xf32>
    %35 = arith.subf %0, %32 : vector<3x512xf32>
    %cst_22 = arith.constant 0.000000e+00 : f32
    %36 = vector.broadcast %cst_22 : f32 to vector<3x512xf32>
    %37 = arith.subf %36, %31 : vector<3x512xf32>
    %38 = math.exp %37 : vector<3x512xf32>
    %39 = arith.mulf %35, %38 : vector<3x512xf32>
    %40 = vector.broadcast %34 : vector<3x1xf32> to vector<3x512xf32>
    %41 = arith.mulf %40, %39 : vector<3x512xf32>
    %42 = arith.addf %5, %41 : vector<3x512xf32>
    %c1 = arith.constant 1 : index
    %c0_23 = arith.constant 0 : index
    %c0_24 = arith.constant 0 : index
    %43 = vector.load %arg5[%c1, %c0_23, %c0_24] : memref<2x80x1xf32, #tpu.memory_space<vmem>>, vector<1x80x1xf32>
    %44 = vector.shape_cast %43 : vector<1x80x1xf32> to vector<80x1xf32>
    %45 = vector.extract_strided_slice %44 {offsets = [72, 0], sizes = [3, 1], strides = [1, 1]} : vector<80x1xf32> to vector<3x1xf32>
    %46 = vector.broadcast %45 : vector<3x1xf32> to vector<3x512xf32>
    %47 = arith.mulf %42, %46 : vector<3x512xf32>
    %c64 = arith.constant 64 : index
    %c0_25 = arith.constant 0 : index
    %48 = vector.load %arg1[%c64, %c0_25] : memref<144x512xf32, #tpu.memory_space<vmem>>, vector<64x512xf32>
    %c1_26 = arith.constant 1 : index
    %c0_27 = arith.constant 0 : index
    %c0_28 = arith.constant 0 : index
    %49 = vector.load %arg2[%c1_26, %c0_27, %c0_28] : memref<2x64x3xf32, #tpu.memory_space<vmem>>, vector<1x64x3xf32>
    %50 = vector.shape_cast %49 : vector<1x64x3xf32> to vector<64x3xf32>
    %cst_29 = arith.constant dense<0.000000e+00> : vector<64x512xf32>
    %51 = tpu.matmul %50, %47, %cst_29 {dimension_numbers = #tpu.dot_dimension_numbers<[1], [0], [0], [1], [0, 0, 1, 1], [], []>} : vector<64x3xf32>, vector<3x512xf32>, vector<64x512xf32> -> vector<64x512xf32>
    %52 = arith.addf %48, %51 : vector<64x512xf32>
    %cst_30 = arith.constant 0.000000e+00 : f32
    %53 = vector.broadcast %cst_30 : f32 to vector<64x512xf32>
    %54 = arith.maximumf %52, %53 : vector<64x512xf32>
    %c1_31 = arith.constant 1 : index
    %c0_32 = arith.constant 0 : index
    %c0_33 = arith.constant 0 : index
    %55 = vector.load %arg3[%c1_31, %c0_32, %c0_33] : memref<2x64x64xf32, #tpu.memory_space<vmem>>, vector<1x64x64xf32>
    %56 = vector.shape_cast %55 : vector<1x64x64xf32> to vector<64x64xf32>
    %cst_34 = arith.constant dense<0.000000e+00> : vector<64x512xf32>
    %57 = tpu.matmul %56, %54, %cst_34 {dimension_numbers = #tpu.dot_dimension_numbers<[1], [0], [0], [1], [0, 0, 1, 1], [], []>} : vector<64x64xf32>, vector<64x512xf32>, vector<64x512xf32> -> vector<64x512xf32>
    %58 = vector.extract_strided_slice %44 {offsets = [0, 0], sizes = [64, 1], strides = [1, 1]} : vector<80x1xf32> to vector<64x1xf32>
    %59 = vector.broadcast %58 : vector<64x1xf32> to vector<64x512xf32>
    %60 = arith.addf %57, %59 : vector<64x512xf32>
    %cst_35 = arith.constant 0.000000e+00 : f32
    %61 = vector.broadcast %cst_35 : f32 to vector<64x512xf32>
    %62 = arith.maximumf %60, %61 : vector<64x512xf32>
    %c1_36 = arith.constant 1 : index
    %c0_37 = arith.constant 0 : index
    %c0_38 = arith.constant 0 : index
    %63 = vector.load %arg4[%c1_36, %c0_37, %c0_38] : memref<2x8x64xf32, #tpu.memory_space<vmem>>, vector<1x8x64xf32>
    %64 = vector.shape_cast %63 : vector<1x8x64xf32> to vector<8x64xf32>
    %cst_39 = arith.constant dense<0.000000e+00> : vector<8x512xf32>
    %65 = tpu.matmul %64, %62, %cst_39 {dimension_numbers = #tpu.dot_dimension_numbers<[1], [0], [0], [1], [0, 0, 1, 1], [], []>} : vector<8x64xf32>, vector<64x512xf32>, vector<8x512xf32> -> vector<8x512xf32>
    %66 = vector.extract_strided_slice %44 {offsets = [64, 0], sizes = [8, 1], strides = [1, 1]} : vector<80x1xf32> to vector<8x1xf32>
    %67 = vector.broadcast %66 : vector<8x1xf32> to vector<8x512xf32>
    %68 = arith.addf %65, %67 : vector<8x512xf32>
    %69 = vector.extract_strided_slice %68 {offsets = [0, 0], sizes = [3, 512], strides = [1, 1]} : vector<8x512xf32> to vector<3x512xf32>
    %cst_40 = arith.constant -1.000000e+01 : f32
    %cst_41 = arith.constant 1.000000e+01 : f32
    %70 = vector.broadcast %cst_40 : f32 to vector<3x512xf32>
    %71 = arith.maximumf %70, %69 : vector<3x512xf32>
    %72 = vector.broadcast %cst_41 : f32 to vector<3x512xf32>
    %73 = arith.minimumf %72, %71 : vector<3x512xf32>
    %74 = vector.extract_strided_slice %68 {offsets = [4, 0], sizes = [3, 512], strides = [1, 1]} : vector<8x512xf32> to vector<3x512xf32>
    %cst_42 = arith.constant 1.000000e+00 : f32
    %75 = vector.broadcast %cst_42 : f32 to vector<3x1xf32>
    %76 = arith.subf %75, %45 : vector<3x1xf32>
    %77 = arith.subf %42, %74 : vector<3x512xf32>
    %cst_43 = arith.constant 0.000000e+00 : f32
    %78 = vector.broadcast %cst_43 : f32 to vector<3x512xf32>
    %79 = arith.subf %78, %73 : vector<3x512xf32>
    %80 = math.exp %79 : vector<3x512xf32>
    %81 = arith.mulf %77, %80 : vector<3x512xf32>
    %82 = vector.broadcast %76 : vector<3x1xf32> to vector<3x512xf32>
    %83 = arith.mulf %82, %81 : vector<3x512xf32>
    %84 = arith.addf %47, %83 : vector<3x512xf32>
    %c128 = arith.constant 128 : index
    %c0_44 = arith.constant 0 : index
    %85 = vector.load %arg1[%c128, %c0_44] : memref<144x512xf32, #tpu.memory_space<vmem>>, vector<15x512xf32>
    %86 = vector.extract_strided_slice %85 {offsets = [0, 0], sizes = [3, 512], strides = [1, 1]} : vector<15x512xf32> to vector<3x512xf32>
    %87 = arith.mulf %84, %86 : vector<3x512xf32>
    %88 = vector.extract_strided_slice %85 {offsets = [3, 0], sizes = [3, 512], strides = [1, 1]} : vector<15x512xf32> to vector<3x512xf32>
    %89 = vector.extract_strided_slice %87 {offsets = [0, 0], sizes = [1, 512], strides = [1, 1]} : vector<3x512xf32> to vector<1x512xf32>
    %90 = vector.extract_strided_slice %85 {offsets = [6, 0], sizes = [3, 512], strides = [1, 1]} : vector<15x512xf32> to vector<3x512xf32>
    %91 = vector.broadcast %89 : vector<1x512xf32> to vector<3x512xf32>
    %92 = arith.mulf %91, %90 : vector<3x512xf32>
    %93 = arith.addf %88, %92 : vector<3x512xf32>
    %94 = vector.extract_strided_slice %87 {offsets = [1, 0], sizes = [1, 512], strides = [1, 1]} : vector<3x512xf32> to vector<1x512xf32>
    %95 = vector.extract_strided_slice %85 {offsets = [9, 0], sizes = [3, 512], strides = [1, 1]} : vector<15x512xf32> to vector<3x512xf32>
    %96 = vector.broadcast %94 : vector<1x512xf32> to vector<3x512xf32>
    %97 = arith.mulf %96, %95 : vector<3x512xf32>
    %98 = arith.addf %93, %97 : vector<3x512xf32>
    %99 = vector.extract_strided_slice %87 {offsets = [2, 0], sizes = [1, 512], strides = [1, 1]} : vector<3x512xf32> to vector<1x512xf32>
    %100 = vector.extract_strided_slice %85 {offsets = [12, 0], sizes = [3, 512], strides = [1, 1]} : vector<15x512xf32> to vector<3x512xf32>
    %101 = vector.broadcast %99 : vector<1x512xf32> to vector<3x512xf32>
    %102 = arith.mulf %101, %100 : vector<3x512xf32>
    %103 = arith.addf %98, %102 : vector<3x512xf32>
    %c0_45 = arith.constant 0 : index
    %c0_46 = arith.constant 0 : index
    %104 = vector.load %arg7[%c0_45, %c0_46] : memref<3x512xf32, #tpu.memory_space<vmem>>, vector<3x512xf32>
    tpu.vector_store %arg7[%c0_45, %c0_46], %103 {strides = array<i32>} : memref<3x512xf32, #tpu.memory_space<vmem>>, vector<3x512xf32>,
    return
  }
  func.func @transform_0(%arg0: i32) -> (i32, i32) {
    %c0_i32 = arith.constant 0 : i32
    %c0_i32_0 = arith.constant 0 : i32
    return %c0_i32, %arg0 : i32, i32
  }
  func.func @transform_1(%arg0: i32) -> (i32, i32, i32) {
    %c0_i32 = arith.constant 0 : i32
    %c0_i32_0 = arith.constant 0 : i32
    %c0_i32_1 = arith.constant 0 : i32
    %c0_i32_2 = arith.constant 0 : i32
    return %c0_i32, %c0_i32_0, %c0_i32_1 : i32, i32, i32
  }
  func.func @transform_2(%arg0: i32) -> (i32, i32, i32) {
    %c0_i32 = arith.constant 0 : i32
    %c0_i32_0 = arith.constant 0 : i32
    %c0_i32_1 = arith.constant 0 : i32
    %c0_i32_2 = arith.constant 0 : i32
    return %c0_i32, %c0_i32_0, %c0_i32_1 : i32, i32, i32
  }
  func.func @transform_3(%arg0: i32) -> (i32, i32, i32) {
    %c0_i32 = arith.constant 0 : i32
    %c0_i32_0 = arith.constant 0 : i32
    %c0_i32_1 = arith.constant 0 : i32
    %c0_i32_2 = arith.constant 0 : i32
    return %c0_i32, %c0_i32_0, %c0_i32_1 : i32, i32, i32
  }
  func.func @transform_4(%arg0: i32) -> (i32, i32, i32) {
    %c0_i32 = arith.constant 0 : i32
    %c0_i32_0 = arith.constant 0 : i32
    %c0_i32_1 = arith.constant 0 : i32
    %c0_i32_2 = arith.constant 0 : i32
    return %c0_i32, %c0_i32_0, %c0_i32_1 : i32, i32, i32
  }
  func.func @transform_5(%arg0: i32) -> (i32, i32) {
    %c0_i32 = arith.constant 0 : i32
    %c0_i32_0 = arith.constant 0 : i32
    return %c0_i32, %arg0 : i32, i32
  }
  func.func @transform_6(%arg0: i32) -> (i32, i32) {
    %c0_i32 = arith.constant 0 : i32
    %c0_i32_0 = arith.constant 0 : i32
    return %c0_i32, %arg0 : i32, i32
  }
}

</mosaic_0001>

<bundles_post_ra>
// kernel: simple_nvp_forward_pallas.1
= control target key start
LH: loop header
LB: loop body
LE: loop exit
PB: predicated region body
PF: predicated region fallthrough
CT: control target
= control target key end

     0   :  { %v2402_v0 = vmov 0   ;;  %v2403_v4 = vmov 0.0   ;;  %v2404_v13 = vmov 839922192   ;;  %v42_v15 = vlaneseq  ;;  %s3085_s4 = inlined_call_operand.vmem [shape: f32[2,80,1], index: 4, kind: input, shape index: {}]   ;;  %s3086_s5 = inlined_call_operand.vmem [shape: f32[3,512], index: 5, kind: input, shape index: {}]   ;;  %s3087_s1 = inlined_call_operand.vmem [shape: f32[2,64,3], index: 1, kind: input, shape index: {}]   ;;  %s3088_s0 = inlined_call_operand.vmem [shape: f32[144,512], index: 0, kind: input, shape index: {}]   ;;  %s3089_s2 = inlined_call_operand.vmem [shape: f32[2,64,64], index: 2, kind: input, shape index: {}]   ;;  %s3090_s3 = inlined_call_operand.vmem [shape: f32[2,8,64], index: 3, kind: input, shape index: {}]   ;;  %s3091_s6 = inlined_call_operand.vmem [shape: f32[3,512], index: 6, kind: output, shape index: {}]  }
   0x1   :  { %2382 = vset.pattern.permute.xlu0 %v2402_v0  ;;  %v34_v1 = vld [vmem:[%s3085_s4 + $0x48] sm:$0xff]  ;;  %2383 = vset.pattern.permute.xlu1 %v2402_v0  ;;  %v25_v2 = vld [vmem:[%s3085_s4] sm:$0xff]  ;;  %v28_v3 = vld [vmem:[%s3085_s4 + $0x18] sm:$0xff]  ;;  %v40_v14 = vunpack.c.l.s4 %v2404_v13  ;;  %vm118_vm0 = vcmask 1042432   ;;  %vm93_vm1 = vcmask 23552   ;;  %vm465_vm2 = vcmask 523264  }
   0x2   :  { %37 = vperm.xlu0 %2382, %v34_v1   ;;  %191 = vmatprep.mubr.f32.mxu0 %v2403_v4  ;;  %v30_v5 = vld [vmem:[%s3085_s4 + $0x28] sm:$0xff]  ;;  %v32_v6 = vld [vmem:[%s3085_s4 + $0x38] sm:$0xff]  ;;  %v907_v7 = vsub.f32 1.0, %v34_v1  ;;  %v2180_v8 = vld [vmem:[%s3085_s4 + $0x50] sm:$0xff]  ;;  %v2472_v17 = vshrl.u32 %v42_v15, 7  ;;  %vm1978_vm3 = vcmask 1044480  }
   0x3   :  { %304 = vmatprep.mubr.f32.mxu1 %v2403_v4  ;;  %v2182_v9 = vld [vmem:[%s3085_s4 + $0x60] sm:$0xff]  ;;  %v2184_v10 = vld [vmem:[%s3085_s4 + $0x70] sm:$0xff]  ;;  %v41_v16 = vunpack.c.0.s8 %v40_v14  ;;  %v2485_v20 = vld [vmem:[%s3086_s5 + $0x8] sm:$0x77]  ;;  %vm2119_vm4 = vcmask 1040384   ;;  %vm2120_vm5 = vcmask 1044484  }
   0x4   :  { %v2186_v11 = vld [vmem:[%s3085_s4 + $0x80] sm:$0xff]  ;;  %v2188_v12 = vld [vmem:[%s3085_s4 + $0x90] sm:$0xff]  ;;  %v82_v28 = vld [vmem:[%s3087_s1 + $0x8] sm:$0xff] }
   0x5   :  { %v2475_v18 = vsub.s32 %v41_v16, %v2472_v17  ;;  %v2480_v19 = vld [vmem:[%s3086_s5] sm:$0x77]  ;;  %v83_v29 = vld [vmem:[%s3087_s1 + $0x10] sm:$0xff]  ;;  %v84_v30 = vld [vmem:[%s3087_s1 + $0x18] sm:$0xff] }
   0x6   :  { %427 = vperm.xlu0 %2382, %v25_v2   ;;  %v81_v27 = vld [vmem:[%s3087_s1] sm:$0xff]  ;;  %v86_v32 = vld [vmem:[%s3087_s1 + $0x28] sm:$0xff]  ;;  %v87_v33 = vld [vmem:[%s3087_s1 + $0x30] sm:$0xff] }
   0x7   :  { %v85_v31 = vld [vmem:[%s3087_s1 + $0x20] sm:$0xff]  ;;  %v88_v34 = vld [vmem:[%s3087_s1 + $0x38] sm:$0xff]  ;;  %v26_v35 = vld [vmem:[%s3085_s4 + $0x8] sm:$0xff] }
   0x8   :  { %432 = vperm.xlu1 %2383, %v26_v35   ;;  %v27_v36 = vld [vmem:[%s3085_s4 + $0x10] sm:$0xff]  ;;  %v29_v37 = vld [vmem:[%s3085_s4 + $0x20] sm:$0xff]  ;;  %v2189_v40 = vld [vmem:[%s3085_s4 + $0x98] sm:$0xff] }
   0x9   :  { %v31_v38 = vld [vmem:[%s3085_s4 + $0x30] sm:$0xff]  ;;  %v33_v39 = vld [vmem:[%s3085_s4 + $0x40] sm:$0xff]  ;;  %v2181_v41 = vld [vmem:[%s3085_s4 + $0x58] sm:$0xff]  ;;  %v1848_v45 = vsub.f32 1.0, %v2189_v40 }
   0xa   :  { %442 = vperm.xlu0 %2382, %v28_v3   ;;  %v2183_v42 = vld [vmem:[%s3085_s4 + $0x68] sm:$0xff]  ;;  %v2185_v43 = vld [vmem:[%s3085_s4 + $0x78] sm:$0xff]  ;;  %v49_v46 = vld [vmem:[%s3088_s0] sm:$0xff] }
   0xb   :  { %v2187_v44 = vld [vmem:[%s3085_s4 + $0x88] sm:$0xff]  ;;  %v51_v48 = vld [vmem:[%s3088_s0 + $0x10] sm:$0xff]  ;;  %v52_v52 = vld [vmem:[%s3088_s0 + $0x18] sm:$0xff] }
   0xc   :  { %437 = vperm.xlu1 %2383, %v27_v36   ;;  %v50_v50 = vld [vmem:[%s3088_s0 + $0x8] sm:$0xff]  ;;  %v53_v54 = vld [vmem:[%s3088_s0 + $0x20] sm:$0xff]  ;;  %v55_v55 = vld [vmem:[%s3088_s0 + $0x30] sm:$0xff] }
   0xd   :  { %v54_v58 = vld [vmem:[%s3088_s0 + $0x28] sm:$0xff]  ;;  %v56_v59 = vld [vmem:[%s3088_s0 + $0x38] sm:$0xff]  ;;  %vm3071_vm6 = vmor %vm2119_vm4, %vm2120_vm5 }
   0xe   :  { %452 = vperm.xlu0 %2382, %v30_v5  }
  0x10   :  { %447 = vperm.xlu1 %2383, %v29_v37   ;;  %v62_v37 = vld [vmem:[%s3088_s0 + $0x68] sm:$0xff] }
  0x12   :  { %462 = vperm.xlu0 %2382, %v32_v6  }
  0x14   :  { %457 = vperm.xlu1 %2383, %v31_v38   ;;  %v64_v38 = vld [vmem:[%s3088_s0 + $0x78] sm:$0xff] }
  0x16   :  { %942 = vperm.xlu0 %2382, %v907_v7  }
  0x18   :  { %751 = vperm.xlu1 %2383, %v33_v39  }
  0x1a   :  { %1368 = vperm.xlu0 %2382, %v2180_v8  }
  0x1c   :  { %978 = vperm.xlu1 %2383, %v2189_v40  }
  0x1e   :  { %1378 = vperm.xlu0 %2382, %v2182_v9  }
  0x20   :  { %1373 = vperm.xlu1 %2383, %v2181_v41  }
  0x22   :  { %1388 = vperm.xlu0 %2382, %v2184_v10  }
  0x24   :  { %1383 = vperm.xlu1 %2383, %v2183_v42  }
  0x26   :  { %1398 = vperm.xlu0 %2382, %v2186_v11   ;;  %v57_v11 = vld [vmem:[%s3088_s0 + $0x40] sm:$0xff] }
  0x28   :  { %1393 = vperm.xlu1 %2383, %v2185_v43  }
  0x2a   :  { %1692 = vperm.xlu0 %2382, %v2188_v12   ;;  %v59_v12 = vld [vmem:[%s3088_s0 + $0x50] sm:$0xff] }
  0x2c   :  { %1403 = vperm.xlu1 %2383, %v2187_v44  }
  0x30   :  { %1883 = vperm.xlu1 %2383, %v1848_v45  }
  0x81   :  { %v38_v21 = vpop.permute.xlu0 %37 }
  0x82   :  { %v45_v22 = vrot.slane %v38_v21, %v2475_v18 }
  0x84   :  { %v2489_v23 = vmul.f32 %v45_v22, %v2480_v19  ;;  %v2492_v24 = vmul.f32 %v45_v22, %v2485_v20 }
  0x86   :  { %v91_v25 = vcombine.high %v2489_v23, %v2489_v23  ;;  %v92_v26 = vcombine.high %v2492_v24, %v2492_v24 }
  0x88   :  { %2138 = vmatprep.subr.msk.mxu0 %vm118_vm0, %v91_v25  ;;  %2148 = vmatprep.subr.msk.mxu1 %vm118_vm0, %v92_v26 }
  0x89   :  { %2139 = vmatpush1.msk.msra.mxu0 %vm118_vm0, %v2489_v23  ;;  %2149 = vmatpush1.msk.msra.mxu1 %vm118_vm0, %v2492_v24 }
  0x8a   :  { %2140 = vmatmul.mubr.msk.f32.vlgmr.msra.gmra.mrb[0].mxu0 %vm93_vm1, %v81_v27  ;;  %2150 = vmatmul.mubr.msk.f32.vlgmr.msra.gmra.mrb[0].mxu1 %vm93_vm1, %v81_v27  ;;  %v58_v27 = vld [vmem:[%s3088_s0 + $0x48] sm:$0xff] }
  0x8b   :  { %197 = vmatprep.mubr.f32.mxu0 %v2403_v4  ;;  %310 = vmatprep.mubr.f32.mxu1 %v2403_v4 }
  0x8e   :  { %2141 = vmatmul.mubr.msk.f32.gmra.mrb[2].mxu0 %vm93_vm1, %v82_v28  ;;  %2151 = vmatmul.mubr.msk.f32.gmra.mrb[2].mxu1 %vm93_vm1, %v82_v28 }
  0x8f   :  { %203 = vmatprep.mubr.f32.mxu0 %v2403_v4  ;;  %316 = vmatprep.mubr.f32.mxu1 %v2403_v4 }
  0x92   :  { %2142 = vmatmul.mubr.msk.f32.gmra.mrb[4].mxu0 %vm93_vm1, %v83_v29  ;;  %2152 = vmatmul.mubr.msk.f32.gmra.mrb[4].mxu1 %vm93_vm1, %v83_v29  ;;  %v60_v29 = vld [vmem:[%s3088_s0 + $0x58] sm:$0xff] }
  0x93   :  { %209 = vmatprep.mubr.f32.mxu0 %v2403_v4  ;;  %322 = vmatprep.mubr.f32.mxu1 %v2403_v4 }
  0x96   :  { %2143 = vmatmul.mubr.msk.f32.gmra.mrb[6].mxu0 %vm93_vm1, %v84_v30  ;;  %2153 = vmatmul.mubr.msk.f32.gmra.mrb[6].mxu1 %vm93_vm1, %v84_v30 }
  0x97   :  { %215 = vmatprep.mubr.f32.mxu0 %v2403_v4  ;;  %328 = vmatprep.mubr.f32.mxu1 %v2403_v4 }
  0x9a   :  { %2144 = vmatmul.mubr.msk.f32.gmra.mrb[8].mxu0 %vm93_vm1, %v85_v31  ;;  %2154 = vmatmul.mubr.msk.f32.gmra.mrb[8].mxu1 %vm93_vm1, %v85_v31 }
  0x9b   :  { %221 = vmatprep.mubr.f32.mxu0 %v2403_v4  ;;  %334 = vmatprep.mubr.f32.mxu1 %v2403_v4 }
  0x9e   :  { %2145 = vmatmul.mubr.msk.f32.gmra.mrb[10].mxu0 %vm93_vm1, %v86_v32  ;;  %2155 = vmatmul.mubr.msk.f32.gmra.mrb[10].mxu1 %vm93_vm1, %v86_v32 }
  0x9f   :  { %227 = vmatprep.mubr.f32.mxu0 %v2403_v4  ;;  %340 = vmatprep.mubr.f32.mxu1 %v2403_v4 }
  0xa2   :  { %2146 = vmatmul.mubr.msk.f32.gmra.mrb[12].mxu0 %vm93_vm1, %v87_v33  ;;  %2156 = vmatmul.mubr.msk.f32.gmra.mrb[12].mxu1 %vm93_vm1, %v87_v33  ;;  %v61_v33 = vld [vmem:[%s3088_s0 + $0x60] sm:$0xff] }
  0xa3   :  { %233 = vmatprep.mubr.f32.mxu0 %v2403_v4  ;;  %346 = vmatprep.mubr.f32.mxu1 %v2403_v4 }
  0xa6   :  { %2147 = vmatmul.mubr.msk.f32.gmra.mrb[14].mxu0 %vm93_vm1, %v88_v34  ;;  %2157 = vmatmul.mubr.msk.f32.gmra.mrb[14].mxu1 %vm93_vm1, %v88_v34  ;;  %v63_v34 = vld [vmem:[%s3088_s0 + $0x70] sm:$0xff] }
  0xa7   :  { %554 = vmatprep.mubr.f32.mxu0 %v2403_v4  ;;  %667 = vmatprep.mubr.f32.mxu1 %v2403_v4 }
 0x15d   :  { %v193_v47 = vpop.f32.mrb[0].mxu0  ;;  %v306_v49 = vpop.f32.mrb[0].mxu1 }
 0x15e   :  { %v195_v51 = vpop.f32.mrb[1].mxu0  ;;  %v308_v53 = vpop.f32.mrb[1].mxu1  ;;  %v353_v56 = vadd.f32 %v193_v47, %v49_v46  ;;  %v355_v57 = vadd.f32 %v306_v49, %v51_v48 }
 0x15f   :  { %v354_v60 = vadd.f32 %v195_v51, %v50_v50  ;;  %v356_v61 = vadd.f32 %v308_v53, %v52_v52  ;;  %v65_v53 = vld [vmem:[%s3088_s0 + $0x80] sm:$0xff] }
 0x160   :  { %v385_v7 = vmax.f32 %v353_v56, 0.0  ;;  %v387_v8 = vmax.f32 %v355_v57, 0.0 }
 0x161   :  { %v199_v62 = vpop.f32.mrb[2].mxu0  ;;  %v312_v63 = vpop.f32.mrb[2].mxu1  ;;  %v386_v13 = vmax.f32 %v354_v60, 0.0  ;;  %v388_v14 = vmax.f32 %v356_v61, 0.0 }
 0x162   :  { %v357_v0 = vadd.f32 %v199_v62, %v53_v54  ;;  %v359_v1 = vadd.f32 %v312_v63, %v55_v55  ;;  %v201_v2 = vpop.f32.mrb[3].mxu0  ;;  %v314_v3 = vpop.f32.mrb[3].mxu1  ;;  %v67_v54 = vld [vmem:[%s3088_s0 + $0x90] sm:$0xff]  ;;  %v66_v63 = vld [vmem:[%s3088_s0 + $0x88] sm:$0xff] }
 0x163   :  { %v358_v5 = vadd.f32 %v201_v2, %v54_v58  ;;  %v360_v6 = vadd.f32 %v314_v3, %v56_v59 }
 0x164   :  { %v389_v9 = vmax.f32 %v357_v0, 0.0  ;;  %v391_v10 = vmax.f32 %v359_v1, 0.0  ;;  %v68_v1 = vld [vmem:[%s3088_s0 + $0x98] sm:$0xff] }
 0x165   :  { %v390_v15 = vmax.f32 %v358_v5, 0.0  ;;  %v392_v16 = vmax.f32 %v360_v6, 0.0  ;;  %v205_v21 = vpop.f32.mrb[4].mxu0  ;;  %v318_v22 = vpop.f32.mrb[4].mxu1  ;;  %v69_v6 = vld [vmem:[%s3088_s0 + $0xa0] sm:$0xff] }
 0x166   :  { %v2253_v25 = vpack.c.bf16 %v389_v9, %v385_v7  ;;  %v2269_v26 = vpack.c.bf16 %v391_v10, %v387_v8  ;;  %v207_v28 = vpop.f32.mrb[5].mxu0  ;;  %v320_v30 = vpop.f32.mrb[5].mxu1  ;;  %v361_v35 = vadd.f32 %v205_v21, %v57_v11  ;;  %v363_v36 = vadd.f32 %v318_v22, %v59_v12  ;;  %v71_v7 = vld [vmem:[%s3088_s0 + $0xb0] sm:$0xff]  ;;  %v70_v10 = vld [vmem:[%s3088_s0 + $0xa8] sm:$0xff]  ;;  %v72_v11 = vld [vmem:[%s3088_s0 + $0xb8] sm:$0xff] }
 0x167   :  { %v2251_v31 = vpack.c.bf16 %v390_v15, %v386_v13  ;;  %v2267_v32 = vpack.c.bf16 %v392_v16, %v388_v14  ;;  %v362_v39 = vadd.f32 %v207_v28, %v58_v27  ;;  %v364_v40 = vadd.f32 %v320_v30, %v60_v29 }
 0x168   :  { %v393_v49 = vmax.f32 %v361_v35, 0.0  ;;  %v395_v50 = vmax.f32 %v363_v36, 0.0 }
 0x169   :  { %v211_v41 = vpop.f32.mrb[6].mxu0  ;;  %v324_v42 = vpop.f32.mrb[6].mxu1  ;;  %2252 = vmatprep.subr.bf16.mxu0 %v2251_v31  ;;  %2268 = vmatprep.subr.bf16.mxu1 %v2267_v32  ;;  %v394_v55 = vmax.f32 %v362_v39, 0.0  ;;  %v396_v56 = vmax.f32 %v364_v40, 0.0  ;;  %v73_v32 = vld [vmem:[%s3088_s0 + $0xc0] sm:$0xff] }
 0x16a   :  { %v365_v43 = vadd.f32 %v211_v41, %v61_v33  ;;  %v367_v44 = vadd.f32 %v324_v42, %v63_v34  ;;  %v213_v45 = vpop.f32.mrb[7].mxu0  ;;  %v326_v46 = vpop.f32.mrb[7].mxu1  ;;  %2254 = vmatpush1.bf16.msra.mxu0 %v2253_v25  ;;  %2270 = vmatpush1.bf16.msra.mxu1 %v2269_v26  ;;  %v75_v33 = vld [vmem:[%s3088_s0 + $0xd0] sm:$0xff]  ;;  %v74_v42 = vld [vmem:[%s3088_s0 + $0xc8] sm:$0xff] }
 0x16b   :  { %v366_v47 = vadd.f32 %v213_v45, %v62_v37  ;;  %v368_v48 = vadd.f32 %v326_v46, %v64_v38 }
 0x16c   :  { %v397_v51 = vmax.f32 %v365_v43, 0.0  ;;  %v399_v52 = vmax.f32 %v367_v44, 0.0  ;;  %v76_v44 = vld [vmem:[%s3088_s0 + $0xd8] sm:$0xff] }
 0x16d   :  { %v398_v57 = vmax.f32 %v366_v47, 0.0  ;;  %v400_v58 = vmax.f32 %v368_v48, 0.0  ;;  %v217_v59 = vpop.f32.mrb[8].mxu0  ;;  %v330_v60 = vpop.f32.mrb[8].mxu1  ;;  %v77_v48 = vld [vmem:[%s3088_s0 + $0xe0] sm:$0xff] }
 0x16e   :  { %v2257_v61 = vpack.c.bf16 %v397_v51, %v393_v49  ;;  %v2273_v62 = vpack.c.bf16 %v399_v52, %v395_v50  ;;  %v219_v0 = vpop.f32.mrb[9].mxu0  ;;  %v332_v2 = vpop.f32.mrb[9].mxu1  ;;  %v369_v8 = vadd.f32 %v217_v59, %v65_v53  ;;  %v371_v9 = vadd.f32 %v330_v60, %v67_v54  ;;  %v79_v49 = vld [vmem:[%s3088_s0 + $0xf0] sm:$0xff]  ;;  %v78_v52 = vld [vmem:[%s3088_s0 + $0xe8] sm:$0xff]  ;;  %v80_v53 = vld [vmem:[%s3088_s0 + $0xf8] sm:$0xff] }
 0x16f   :  { %v2255_v3 = vpack.c.bf16 %v398_v57, %v394_v55  ;;  %v2271_v5 = vpack.c.bf16 %v400_v58, %v396_v56  ;;  %v370_v12 = vadd.f32 %v219_v0, %v66_v63  ;;  %v372_v13 = vadd.f32 %v332_v2, %v68_v1 }
 0x170   :  { %v401_v28 = vmax.f32 %v369_v8, 0.0  ;;  %v403_v29 = vmax.f32 %v371_v9, 0.0 }
 0x171   :  { %v223_v14 = vpop.f32.mrb[10].mxu0  ;;  %v336_v15 = vpop.f32.mrb[10].mxu1  ;;  %2256 = vmatprep.subr.bf16.mxu0 %v2255_v3  ;;  %2272 = vmatprep.subr.bf16.mxu1 %v2271_v5  ;;  %v402_v34 = vmax.f32 %v370_v12, 0.0  ;;  %v404_v35 = vmax.f32 %v372_v13, 0.0  ;;  %v417_v13 = vld [vmem:[%s3089_s2] sm:$0xff] }
 0x172   :  { %v373_v16 = vadd.f32 %v223_v14, %v69_v6  ;;  %v375_v21 = vadd.f32 %v336_v15, %v71_v7  ;;  %v225_v22 = vpop.f32.mrb[11].mxu0  ;;  %v338_v25 = vpop.f32.mrb[11].mxu1  ;;  %2258 = vmatpush1.bf16.msra.mxu0 %v2257_v61  ;;  %2274 = vmatpush1.bf16.msra.mxu1 %v2273_v62  ;;  %v418_v14 = vld [vmem:[%s3089_s2 + $0x8] sm:$0xff]  ;;  %v419_v15 = vld [vmem:[%s3089_s2 + $0x10] sm:$0xff] }
 0x173   :  { %v374_v26 = vadd.f32 %v225_v22, %v70_v10  ;;  %v376_v27 = vadd.f32 %v338_v25, %v72_v11  ;;  %v422_v22 = vld [vmem:[%s3089_s2 + $0x28] sm:$0xff]  ;;  %v423_v25 = vld [vmem:[%s3089_s2 + $0x30] sm:$0xff] }
 0x174   :  { %v405_v30 = vmax.f32 %v373_v16, 0.0  ;;  %v407_v31 = vmax.f32 %v375_v21, 0.0  ;;  %v420_v16 = vld [vmem:[%s3089_s2 + $0x18] sm:$0xff]  ;;  %v421_v21 = vld [vmem:[%s3089_s2 + $0x20] sm:$0xff] }
 0x175   :  { %v406_v36 = vmax.f32 %v374_v26, 0.0  ;;  %v408_v37 = vmax.f32 %v376_v27, 0.0  ;;  %v229_v38 = vpop.f32.mrb[12].mxu0  ;;  %v342_v39 = vpop.f32.mrb[12].mxu1  ;;  %v424_v26 = vld [vmem:[%s3089_s2 + $0x38] sm:$0xff] }
 0x176   :  { %v2261_v40 = vpack.c.bf16 %v405_v30, %v401_v28  ;;  %v2277_v41 = vpack.c.bf16 %v407_v31, %v403_v29  ;;  %v231_v43 = vpop.f32.mrb[13].mxu0  ;;  %v344_v45 = vpop.f32.mrb[13].mxu1  ;;  %v377_v50 = vadd.f32 %v229_v38, %v73_v32  ;;  %v379_v51 = vadd.f32 %v342_v39, %v75_v33 }
 0x177   :  { %v2259_v46 = vpack.c.bf16 %v406_v36, %v402_v34  ;;  %v2275_v47 = vpack.c.bf16 %v408_v37, %v404_v35  ;;  %v378_v54 = vadd.f32 %v231_v43, %v74_v42  ;;  %v380_v55 = vadd.f32 %v344_v45, %v76_v44  ;;  %v428_v31 = vpop.permute.xlu0 %427  ;;  %v433_v32 = vpop.permute.xlu1 %432 }
 0x178   :  { %v409_v0 = vmax.f32 %v377_v50, 0.0  ;;  %v411_v1 = vmax.f32 %v379_v51, 0.0 }
 0x179   :  { %v235_v56 = vpop.f32.mrb[14].mxu0  ;;  %v348_v57 = vpop.f32.mrb[14].mxu1  ;;  %2260 = vmatprep.subr.bf16.mxu0 %v2259_v46  ;;  %2276 = vmatprep.subr.bf16.mxu1 %v2275_v47  ;;  %v410_v5 = vmax.f32 %v378_v54, 0.0  ;;  %v412_v6 = vmax.f32 %v380_v55, 0.0 }
 0x17a   :  { %v381_v58 = vadd.f32 %v235_v56, %v77_v48  ;;  %v383_v59 = vadd.f32 %v348_v57, %v79_v49  ;;  %v237_v60 = vpop.f32.mrb[15].mxu0  ;;  %v350_v61 = vpop.f32.mrb[15].mxu1  ;;  %2262 = vmatpush1.bf16.msra.mxu0 %v2261_v40  ;;  %2278 = vmatpush1.bf16.msra.mxu1 %v2277_v41 }
 0x17b   :  { %v382_v62 = vadd.f32 %v237_v60, %v78_v52  ;;  %v384_v63 = vadd.f32 %v350_v61, %v80_v53 }
 0x17c   :  { %v413_v2 = vmax.f32 %v381_v58, 0.0  ;;  %v415_v3 = vmax.f32 %v383_v59, 0.0  ;;  %v438_v59 = vpop.permute.xlu1 %437 }
 0x17d   :  { %v414_v7 = vmax.f32 %v382_v62, 0.0  ;;  %v416_v8 = vmax.f32 %v384_v63, 0.0  ;;  %v443_v62 = vpop.permute.xlu0 %442 }
 0x17e   :  { %v2265_v9 = vpack.c.bf16 %v413_v2, %v409_v0  ;;  %v2281_v10 = vpack.c.bf16 %v415_v3, %v411_v1 }
 0x17f   :  { %v2263_v11 = vpack.c.bf16 %v414_v7, %v410_v5  ;;  %v2279_v12 = vpack.c.bf16 %v416_v8, %v412_v6 }
 0x181   :  { %2264 = vmatprep.subr.bf16.mxu0 %v2263_v11  ;;  %2280 = vmatprep.subr.bf16.mxu1 %v2279_v12 }
 0x182   :  { %2266 = vmatpush1.bf16.msra.mxu0 %v2265_v9  ;;  %2282 = vmatpush1.bf16.msra.mxu1 %v2281_v10 }
 0x185   :  { %2158 = vmatmul.mubr.msk.f32.vlgmr.msra.gmra.mrb[16].mxu0 %vm465_vm2, %v417_v13  ;;  %2166 = vmatmul.mubr.msk.f32.vlgmr.msra.gmra.mrb[16].mxu1 %vm465_vm2, %v417_v13 }
 0x186   :  { %560 = vmatprep.mubr.f32.mxu0 %v2403_v4  ;;  %673 = vmatprep.mubr.f32.mxu1 %v2403_v4 }
 0x189   :  { %2159 = vmatmul.mubr.msk.f32.gmra.mrb[18].mxu0 %vm465_vm2, %v418_v14  ;;  %2167 = vmatmul.mubr.msk.f32.gmra.mrb[18].mxu1 %vm465_vm2, %v418_v14 }
 0x18a   :  { %566 = vmatprep.mubr.f32.mxu0 %v2403_v4  ;;  %679 = vmatprep.mubr.f32.mxu1 %v2403_v4 }
 0x18d   :  { %2160 = vmatmul.mubr.msk.f32.gmra.mrb[20].mxu0 %vm465_vm2, %v419_v15  ;;  %2168 = vmatmul.mubr.msk.f32.gmra.mrb[20].mxu1 %vm465_vm2, %v419_v15 }
 0x18e   :  { %572 = vmatprep.mubr.f32.mxu0 %v2403_v4  ;;  %685 = vmatprep.mubr.f32.mxu1 %v2403_v4 }
 0x191   :  { %2161 = vmatmul.mubr.msk.f32.gmra.mrb[22].mxu0 %vm465_vm2, %v420_v16  ;;  %2169 = vmatmul.mubr.msk.f32.gmra.mrb[22].mxu1 %vm465_vm2, %v420_v16 }
 0x192   :  { %578 = vmatprep.mubr.f32.mxu0 %v2403_v4  ;;  %691 = vmatprep.mubr.f32.mxu1 %v2403_v4 }
 0x195   :  { %2162 = vmatmul.mubr.msk.f32.gmra.mrb[24].mxu0 %vm465_vm2, %v421_v21  ;;  %2170 = vmatmul.mubr.msk.f32.gmra.mrb[24].mxu1 %vm465_vm2, %v421_v21 }
 0x196   :  { %584 = vmatprep.mubr.f32.mxu0 %v2403_v4  ;;  %697 = vmatprep.mubr.f32.mxu1 %v2403_v4 }
 0x199   :  { %2163 = vmatmul.mubr.msk.f32.gmra.mrb[26].mxu0 %vm465_vm2, %v422_v22  ;;  %2171 = vmatmul.mubr.msk.f32.gmra.mrb[26].mxu1 %vm465_vm2, %v422_v22 }
 0x19a   :  { %590 = vmatprep.mubr.f32.mxu0 %v2403_v4  ;;  %703 = vmatprep.mubr.f32.mxu1 %v2403_v4 }
 0x19d   :  { %2164 = vmatmul.mubr.msk.f32.gmra.mrb[28].mxu0 %vm465_vm2, %v423_v25  ;;  %2172 = vmatmul.mubr.msk.f32.gmra.mrb[28].mxu1 %vm465_vm2, %v423_v25 }
 0x19e   :  { %596 = vmatprep.mubr.f32.mxu0 %v2403_v4  ;;  %709 = vmatprep.mubr.f32.mxu1 %v2403_v4 }
 0x1a1   :  { %2165 = vmatmul.mubr.msk.f32.gmra.mrb[30].mxu0 %vm465_vm2, %v424_v26  ;;  %2173 = vmatmul.mubr.msk.f32.gmra.mrb[30].mxu1 %vm465_vm2, %v424_v26 }
 0x1a2   :  { %821 = vmatprep.mubr.f32.mxu0 %v2403_v4  ;;  %892 = vmatprep.mubr.f32.mxu1 %v2403_v4 }
 0x258   :  { %v556_v27 = vpop.f32.mrb[16].mxu0  ;;  %v669_v28 = vpop.f32.mrb[16].mxu1 }
 0x259   :  { %v558_v29 = vpop.f32.mrb[17].mxu0  ;;  %v671_v30 = vpop.f32.mrb[17].mxu1  ;;  %v557_v33 = vadd.f32 %v556_v27, %v428_v31  ;;  %v670_v34 = vadd.f32 %v669_v28, %v428_v31 }
 0x25a   :  { %v559_v35 = vadd.f32 %v558_v29, %v428_v31  ;;  %v672_v36 = vadd.f32 %v671_v30, %v428_v31 }
 0x25b   :  { %v716_v45 = vmax.f32 %v557_v33, 0.0  ;;  %v718_v46 = vmax.f32 %v670_v34, 0.0 }
 0x25c   :  { %v562_v37 = vpop.f32.mrb[18].mxu0  ;;  %v675_v38 = vpop.f32.mrb[18].mxu1  ;;  %v717_v49 = vmax.f32 %v559_v35, 0.0  ;;  %v719_v50 = vmax.f32 %v672_v36, 0.0 }
 0x25d   :  { %v563_v39 = vadd.f32 %v562_v37, %v433_v32  ;;  %v676_v40 = vadd.f32 %v675_v38, %v433_v32  ;;  %v564_v41 = vpop.f32.mrb[19].mxu0  ;;  %v677_v42 = vpop.f32.mrb[19].mxu1 }
 0x25e   :  { %v565_v43 = vadd.f32 %v564_v41, %v433_v32  ;;  %v678_v44 = vadd.f32 %v677_v42, %v433_v32  ;;  %v448_v32 = vpop.permute.xlu1 %447  ;;  %v453_v35 = vpop.permute.xlu0 %452 }
 0x25f   :  { %v720_v47 = vmax.f32 %v563_v39, 0.0  ;;  %v722_v48 = vmax.f32 %v676_v40, 0.0 }
 0x260   :  { %v721_v51 = vmax.f32 %v565_v43, 0.0  ;;  %v723_v52 = vmax.f32 %v678_v44, 0.0  ;;  %v568_v53 = vpop.f32.mrb[20].mxu0  ;;  %v681_v54 = vpop.f32.mrb[20].mxu1 }
 0x261   :  { %v2285_v55 = vpack.c.bf16 %v720_v47, %v716_v45  ;;  %v2301_v56 = vpack.c.bf16 %v722_v48, %v718_v46  ;;  %v570_v57 = vpop.f32.mrb[21].mxu0  ;;  %v683_v58 = vpop.f32.mrb[21].mxu1  ;;  %v569_v63 = vadd.f32 %v568_v53, %v438_v59  ;;  %v682_v0 = vadd.f32 %v681_v54, %v438_v59 }
 0x262   :  { %v2283_v60 = vpack.c.bf16 %v721_v51, %v717_v49  ;;  %v2299_v61 = vpack.c.bf16 %v723_v52, %v719_v50  ;;  %v571_v1 = vadd.f32 %v570_v57, %v438_v59  ;;  %v684_v2 = vadd.f32 %v683_v58, %v438_v59 }
 0x263   :  { %v724_v12 = vmax.f32 %v569_v63, 0.0  ;;  %v726_v13 = vmax.f32 %v682_v0, 0.0 }
 0x264   :  { %v574_v3 = vpop.f32.mrb[22].mxu0  ;;  %v687_v5 = vpop.f32.mrb[22].mxu1  ;;  %2284 = vmatprep.subr.bf16.mxu0 %v2283_v60  ;;  %2300 = vmatprep.subr.bf16.mxu1 %v2299_v61  ;;  %v725_v16 = vmax.f32 %v571_v1, 0.0  ;;  %v727_v21 = vmax.f32 %v684_v2, 0.0 }
 0x265   :  { %v575_v6 = vadd.f32 %v574_v3, %v443_v62  ;;  %v688_v7 = vadd.f32 %v687_v5, %v443_v62  ;;  %v576_v8 = vpop.f32.mrb[23].mxu0  ;;  %v689_v9 = vpop.f32.mrb[23].mxu1  ;;  %2286 = vmatpush1.bf16.msra.mxu0 %v2285_v55  ;;  %2302 = vmatpush1.bf16.msra.mxu1 %v2301_v56 }
 0x266   :  { %v577_v10 = vadd.f32 %v576_v8, %v443_v62  ;;  %v690_v11 = vadd.f32 %v689_v9, %v443_v62  ;;  %v458_v62 = vpop.permute.xlu1 %457  ;;  %v463_v1 = vpop.permute.xlu0 %462 }
 0x267   :  { %v728_v14 = vmax.f32 %v575_v6, 0.0  ;;  %v730_v15 = vmax.f32 %v688_v7, 0.0 }
 0x268   :  { %v729_v22 = vmax.f32 %v577_v10, 0.0  ;;  %v731_v25 = vmax.f32 %v690_v11, 0.0  ;;  %v580_v26 = vpop.f32.mrb[24].mxu0  ;;  %v693_v27 = vpop.f32.mrb[24].mxu1 }
 0x269   :  { %v2289_v28 = vpack.c.bf16 %v728_v14, %v724_v12  ;;  %v2305_v29 = vpack.c.bf16 %v730_v15, %v726_v13  ;;  %v582_v30 = vpop.f32.mrb[25].mxu0  ;;  %v695_v31 = vpop.f32.mrb[25].mxu1  ;;  %v581_v36 = vadd.f32 %v580_v26, %v448_v32  ;;  %v694_v37 = vadd.f32 %v693_v27, %v448_v32 }
 0x26a   :  { %v2287_v33 = vpack.c.bf16 %v729_v22, %v725_v16  ;;  %v2303_v34 = vpack.c.bf16 %v731_v25, %v727_v21  ;;  %v583_v38 = vadd.f32 %v582_v30, %v448_v32  ;;  %v696_v39 = vadd.f32 %v695_v31, %v448_v32 }
 0x26b   :  { %v732_v48 = vmax.f32 %v581_v36, 0.0  ;;  %v734_v49 = vmax.f32 %v694_v37, 0.0 }
 0x26c   :  { %v586_v40 = vpop.f32.mrb[26].mxu0  ;;  %v699_v41 = vpop.f32.mrb[26].mxu1  ;;  %2288 = vmatprep.subr.bf16.mxu0 %v2287_v33  ;;  %2304 = vmatprep.subr.bf16.mxu1 %v2303_v34  ;;  %v733_v52 = vmax.f32 %v583_v38, 0.0  ;;  %v735_v53 = vmax.f32 %v696_v39, 0.0  ;;  %v748_v33 = vld [vmem:[%s3090_s3] sm:$0xff] }
 0x26d   :  { %v587_v42 = vadd.f32 %v586_v40, %v453_v35  ;;  %v700_v43 = vadd.f32 %v699_v41, %v453_v35  ;;  %v588_v44 = vpop.f32.mrb[27].mxu0  ;;  %v701_v45 = vpop.f32.mrb[27].mxu1  ;;  %2290 = vmatpush1.bf16.msra.mxu0 %v2289_v28  ;;  %2306 = vmatpush1.bf16.msra.mxu1 %v2305_v29 }
 0x26e   :  { %v589_v46 = vadd.f32 %v588_v44, %v453_v35  ;;  %v702_v47 = vadd.f32 %v701_v45, %v453_v35  ;;  %v752_v34 = vpop.permute.xlu1 %751 }
 0x26f   :  { %v736_v50 = vmax.f32 %v587_v42, 0.0  ;;  %v738_v51 = vmax.f32 %v700_v43, 0.0 }
 0x270   :  { %v737_v54 = vmax.f32 %v589_v46, 0.0  ;;  %v739_v55 = vmax.f32 %v702_v47, 0.0  ;;  %v592_v56 = vpop.f32.mrb[28].mxu0  ;;  %v705_v57 = vpop.f32.mrb[28].mxu1 }
 0x271   :  { %v2293_v58 = vpack.c.bf16 %v736_v50, %v732_v48  ;;  %v2309_v59 = vpack.c.bf16 %v738_v51, %v734_v49  ;;  %v594_v60 = vpop.f32.mrb[29].mxu0  ;;  %v707_v61 = vpop.f32.mrb[29].mxu1  ;;  %v593_v2 = vadd.f32 %v592_v56, %v458_v62  ;;  %v706_v3 = vadd.f32 %v705_v57, %v458_v62 }
 0x272   :  { %v2291_v63 = vpack.c.bf16 %v737_v54, %v733_v52  ;;  %v2307_v0 = vpack.c.bf16 %v739_v55, %v735_v53  ;;  %v595_v5 = vadd.f32 %v594_v60, %v458_v62  ;;  %v708_v6 = vadd.f32 %v707_v61, %v458_v62 }
 0x273   :  { %v740_v15 = vmax.f32 %v593_v2, 0.0  ;;  %v742_v16 = vmax.f32 %v706_v3, 0.0 }
 0x274   :  { %v598_v7 = vpop.f32.mrb[30].mxu0  ;;  %v711_v8 = vpop.f32.mrb[30].mxu1  ;;  %2292 = vmatprep.subr.bf16.mxu0 %v2291_v63  ;;  %2308 = vmatprep.subr.bf16.mxu1 %v2307_v0  ;;  %v741_v25 = vmax.f32 %v595_v5, 0.0  ;;  %v743_v26 = vmax.f32 %v708_v6, 0.0 }
 0x275   :  { %v599_v9 = vadd.f32 %v598_v7, %v463_v1  ;;  %v712_v10 = vadd.f32 %v711_v8, %v463_v1  ;;  %v600_v11 = vpop.f32.mrb[31].mxu0  ;;  %v713_v12 = vpop.f32.mrb[31].mxu1  ;;  %2294 = vmatpush1.bf16.msra.mxu0 %v2293_v58  ;;  %2310 = vmatpush1.bf16.msra.mxu1 %v2309_v59 }
 0x276   :  { %v601_v13 = vadd.f32 %v600_v11, %v463_v1  ;;  %v714_v14 = vadd.f32 %v713_v12, %v463_v1  ;;  %v943_v5 = vpop.permute.xlu0 %942  ;;  %v979_v12 = vpop.permute.xlu1 %978 }
 0x277   :  { %v744_v21 = vmax.f32 %v599_v9, 0.0  ;;  %v746_v22 = vmax.f32 %v712_v10, 0.0 }
 0x278   :  { %v745_v27 = vmax.f32 %v601_v13, 0.0  ;;  %v747_v28 = vmax.f32 %v714_v14, 0.0  ;;  %v986_v14 = vrot.slane %v979_v12, %v2475_v18  ;;  %v2190_v18 = vld [vmem:[%s3087_s1 + $0x40] sm:$0xff] }
 0x279   :  { %v2297_v29 = vpack.c.bf16 %v744_v21, %v740_v15  ;;  %v2313_v30 = vpack.c.bf16 %v746_v22, %v742_v16 }
 0x27a   :  { %v2295_v31 = vpack.c.bf16 %v745_v27, %v741_v25  ;;  %v2311_v32 = vpack.c.bf16 %v747_v28, %v743_v26  ;;  %v2193_v25 = vld [vmem:[%s3087_s1 + $0x58] sm:$0xff]  ;;  %v2194_v26 = vld [vmem:[%s3087_s1 + $0x60] sm:$0xff]  ;;  %v2195_v27 = vld [vmem:[%s3087_s1 + $0x68] sm:$0xff] }
 0x27b   :  { %v2196_v28 = vld [vmem:[%s3087_s1 + $0x70] sm:$0xff] }
 0x27c   :  { %2296 = vmatprep.subr.bf16.mxu0 %v2295_v31  ;;  %2312 = vmatprep.subr.bf16.mxu1 %v2311_v32  ;;  %v992_v32 = vld [vmem:[%s3088_s0 + $0x110] sm:$0xff] }
 0x27d   :  { %2298 = vmatpush1.bf16.msra.mxu0 %v2297_v29  ;;  %2314 = vmatpush1.bf16.msra.mxu1 %v2313_v30  ;;  %v2197_v29 = vld [vmem:[%s3087_s1 + $0x78] sm:$0xff]  ;;  %v990_v30 = vld [vmem:[%s3088_s0 + $0x100] sm:$0xff] }
 0x280   :  { %2174 = vmatmul.mubr.msk.f32.vlgmr.msra.gmra.mrb[32].mxu0 %vm465_vm2, %v748_v33  ;;  %2175 = vmatmul.mubr.msk.f32.vlgmr.msra.gmra.mrb[32].mxu1 %vm465_vm2, %v748_v33 }
 0x281   :  { %1131 = vmatprep.mubr.f32.mxu0 %v2403_v4  ;;  %1244 = vmatprep.mubr.f32.mxu1 %v2403_v4 }
 0x353   :  { %v823_v35 = vpop.f32.mrb[32].mxu0  ;;  %v894_v36 = vpop.f32.mrb[32].mxu1 }
 0x354   :  { %v824_v37 = vadd.f32 %v823_v35, %v752_v34  ;;  %v895_v38 = vadd.f32 %v894_v36, %v752_v34  ;;  %v825_v39 = vpop.f32.mrb[33].mxu0  ;;  %v896_v40 = vpop.f32.mrb[33].mxu1  ;;  %v993_v36 = vld [vmem:[%s3088_s0 + $0x118] sm:$0xff] }
 0x355   :  { %v826_v41 = vadd.f32 %v825_v39, %v752_v34  ;;  %v897_v42 = vadd.f32 %v896_v40, %v752_v34  ;;  %v991_v34 = vld [vmem:[%s3088_s0 + $0x108] sm:$0xff]  ;;  %v996_v40 = vld [vmem:[%s3088_s0 + $0x130] sm:$0xff] }
 0x356   :  { %v2176_v43 = vclamps-f32 %v824_v37, 10.0  ;;  %v2178_v44 = vclamps-f32 %v895_v38, 10.0 }
 0x357   :  { %v2177_v45 = vclamps-f32 %v826_v41, 10.0  ;;  %v912_v46 = vcombine.high %v824_v37, %v826_v41  ;;  %v2179_v47 = vclamps-f32 %v897_v42, 10.0  ;;  %v913_v48 = vcombine.high %v895_v38, %v897_v42  ;;  %v994_v38 = vld [vmem:[%s3088_s0 + $0x120] sm:$0xff]  ;;  %v995_v41 = vld [vmem:[%s3088_s0 + $0x128] sm:$0xff] }
 0x358   :  { %v918_v49 = vsub.f32 0.0, %v2176_v43  ;;  %v920_v50 = vsub.f32 0.0, %v2178_v44 }
 0x359   :  { %v919_v51 = vsub.f32 0.0, %v2177_v45  ;;  %v921_v52 = vsub.f32 0.0, %v2179_v47  ;;  %v916_v61 = vsub.f32 %v2480_v19, %v912_v46  ;;  %v917_v63 = vsub.f32 %v2485_v20, %v913_v48  ;;  %v997_v45 = vld [vmem:[%s3088_s0 + $0x138] sm:$0xff] }
 0x35a   :  { %v922_v53 = vmul.f32 1.442695, %v918_v49  ;;  %v926_v54 = vmul.f32 1.442695, %v920_v50 }
 0x35b   :  { %v924_v55 = vmul.f32 1.442695, %v919_v51  ;;  %v928_v56 = vmul.f32 1.442695, %v921_v52 }
 0x35c   :  { %2386 = vpow2.f32 %v922_v53 }
 0x35d   :  { %2388 = vpow2.f32 %v926_v54 }
 0x35e   :  { %2390 = vpow2.f32 %v924_v55 }
 0x35f   :  { %2392 = vpow2.f32 %v928_v56 }
 0x366   :  { %v2387_v57 = vpop.eup %2386 }
 0x367   :  { %v2389_v58 = vpop.eup %2388 }
 0x368   :  { %v2391_v59 = vpop.eup %2390 }
 0x369   :  { %v2393_v60 = vpop.eup %2392  ;;  %v934_v62 = vcombine.low %v2387_v57, %v2391_v59 }
 0x36a   :  { %v935_v0 = vcombine.low %v2389_v58, %v2393_v60  ;;  %v998_v60 = vld [vmem:[%s3088_s0 + $0x140] sm:$0xff] }
 0x36b   :  { %v938_v1 = vmul.f32 %v934_v62, %v916_v61 }
 0x36c   :  { %v939_v2 = vmul.f32 %v935_v0, %v917_v63 }
 0x36d   :  { %v947_v3 = vcombine.high %v938_v1, %v938_v1  ;;  %v951_v7 = vmul.f32 %v943_v5, %v938_v1  ;;  %v1000_v1 = vld [vmem:[%s3088_s0 + $0x150] sm:$0xff] }
 0x36e   :  { %v948_v6 = vcombine.high %v939_v2, %v939_v2  ;;  %v953_v9 = vmul.f32 %v943_v5, %v939_v2 }
 0x36f   :  { %v952_v8 = vmul.f32 %v947_v3, %v943_v5  ;;  %v999_v3 = vld [vmem:[%s3088_s0 + $0x148] sm:$0xff] }
 0x370   :  { %v954_v10 = vmul.f32 %v948_v6, %v943_v5 }
 0x371   :  { %v959_v11 = vcombine.low %v951_v7, %v952_v8  ;;  %v1001_v8 = vld [vmem:[%s3088_s0 + $0x158] sm:$0xff] }
 0x372   :  { %v960_v13 = vcombine.low %v953_v9, %v954_v10  ;;  %v1002_v10 = vld [vmem:[%s3088_s0 + $0x160] sm:$0xff] }
 0x373   :  { %v2753_v19 = vadd.f32 %v959_v11, %v2489_v23  ;;  %v2191_v23 = vld [vmem:[%s3087_s1 + $0x48] sm:$0xff] }
 0x374   :  { %v2756_v20 = vadd.f32 %v960_v13, %v2492_v24  ;;  %v2192_v24 = vld [vmem:[%s3087_s1 + $0x50] sm:$0xff] }
 0x375   :  { %v2759_v15 = vmul.f32 %v986_v14, %v2753_v19  ;;  %v1004_v13 = vld [vmem:[%s3088_s0 + $0x170] sm:$0xff] }
 0x376   :  { %v2762_v16 = vmul.f32 %v986_v14, %v2756_v20  ;;  %v1003_v14 = vld [vmem:[%s3088_s0 + $0x168] sm:$0xff] }
 0x377   :  { %v1033_v21 = vcombine.high %v2759_v15, %v2759_v15 }
 0x378   :  { %v1034_v22 = vcombine.high %v2762_v16, %v2762_v16 }
 0x379   :  { %2198 = vmatprep.subr.msk.mxu0 %vm118_vm0, %v1033_v21 }
 0x37a   :  { %2208 = vmatprep.subr.msk.mxu1 %vm118_vm0, %v1034_v22  ;;  %2199 = vmatpush1.msk.msra.mxu0 %vm118_vm0, %v2759_v15 }
 0x37b   :  { %2209 = vmatpush1.msk.msra.mxu1 %vm118_vm0, %v2762_v16  ;;  %2200 = vmatmul.mubr.msk.f32.vlgmr.msra.gmra.mrb[34].mxu0 %vm93_vm1, %v2190_v18 }
 0x37c   :  { %2210 = vmatmul.mubr.msk.f32.vlgmr.msra.gmra.mrb[34].mxu1 %vm93_vm1, %v2190_v18  ;;  %1137 = vmatprep.mubr.f32.mxu0 %v2403_v4 }
 0x37d   :  { %1250 = vmatprep.mubr.f32.mxu1 %v2403_v4 }
 0x37f   :  { %2201 = vmatmul.mubr.msk.f32.gmra.mrb[36].mxu0 %vm93_vm1, %v2191_v23 }
 0x380   :  { %2211 = vmatmul.mubr.msk.f32.gmra.mrb[36].mxu1 %vm93_vm1, %v2191_v23  ;;  %1143 = vmatprep.mubr.f32.mxu0 %v2403_v4  ;;  %v1005_v23 = vld [vmem:[%s3088_s0 + $0x178] sm:$0xff] }
 0x381   :  { %1256 = vmatprep.mubr.f32.mxu1 %v2403_v4 }
 0x383   :  { %2202 = vmatmul.mubr.msk.f32.gmra.mrb[38].mxu0 %vm93_vm1, %v2192_v24 }
 0x384   :  { %2212 = vmatmul.mubr.msk.f32.gmra.mrb[38].mxu1 %vm93_vm1, %v2192_v24  ;;  %1149 = vmatprep.mubr.f32.mxu0 %v2403_v4 }
 0x385   :  { %1262 = vmatprep.mubr.f32.mxu1 %v2403_v4 }
 0x387   :  { %2203 = vmatmul.mubr.msk.f32.gmra.mrb[40].mxu0 %vm93_vm1, %v2193_v25 }
 0x388   :  { %2213 = vmatmul.mubr.msk.f32.gmra.mrb[40].mxu1 %vm93_vm1, %v2193_v25  ;;  %1155 = vmatprep.mubr.f32.mxu0 %v2403_v4 }
 0x389   :  { %1268 = vmatprep.mubr.f32.mxu1 %v2403_v4 }
 0x38b   :  { %2204 = vmatmul.mubr.msk.f32.gmra.mrb[42].mxu0 %vm93_vm1, %v2194_v26 }
 0x38c   :  { %2214 = vmatmul.mubr.msk.f32.gmra.mrb[42].mxu1 %vm93_vm1, %v2194_v26  ;;  %1161 = vmatprep.mubr.f32.mxu0 %v2403_v4 }
 0x38d   :  { %1274 = vmatprep.mubr.f32.mxu1 %v2403_v4 }
 0x38f   :  { %2205 = vmatmul.mubr.msk.f32.gmra.mrb[44].mxu0 %vm93_vm1, %v2195_v27 }
 0x390   :  { %2215 = vmatmul.mubr.msk.f32.gmra.mrb[44].mxu1 %vm93_vm1, %v2195_v27  ;;  %1167 = vmatprep.mubr.f32.mxu0 %v2403_v4 }
 0x391   :  { %1280 = vmatprep.mubr.f32.mxu1 %v2403_v4 }
 0x393   :  { %2206 = vmatmul.mubr.msk.f32.gmra.mrb[46].mxu0 %vm93_vm1, %v2196_v28 }
 0x394   :  { %2216 = vmatmul.mubr.msk.f32.gmra.mrb[46].mxu1 %vm93_vm1, %v2196_v28  ;;  %1173 = vmatprep.mubr.f32.mxu0 %v2403_v4 }
 0x395   :  { %1286 = vmatprep.mubr.f32.mxu1 %v2403_v4 }
 0x397   :  { %2207 = vmatmul.mubr.msk.f32.gmra.mrb[48].mxu0 %vm93_vm1, %v2197_v29 }
 0x398   :  { %2217 = vmatmul.mubr.msk.f32.gmra.mrb[48].mxu1 %vm93_vm1, %v2197_v29  ;;  %1494 = vmatprep.mubr.f32.mxu0 %v2403_v4 }
 0x399   :  { %1607 = vmatprep.mubr.f32.mxu1 %v2403_v4 }
 0x44e   :  { %v1133_v31 = vpop.f32.mrb[34].mxu0 }
 0x44f   :  { %v1246_v33 = vpop.f32.mrb[34].mxu1  ;;  %v1135_v35 = vpop.f32.mrb[35].mxu0  ;;  %v1293_v39 = vadd.f32 %v1133_v31, %v990_v30 }
 0x450   :  { %v1248_v37 = vpop.f32.mrb[35].mxu1  ;;  %v1295_v42 = vadd.f32 %v1246_v33, %v992_v32  ;;  %v1294_v43 = vadd.f32 %v1135_v35, %v991_v34 }
 0x451   :  { %v1296_v46 = vadd.f32 %v1248_v37, %v993_v36  ;;  %v1325_v53 = vmax.f32 %v1293_v39, 0.0 }
 0x452   :  { %v1139_v44 = vpop.f32.mrb[36].mxu0  ;;  %v1327_v56 = vmax.f32 %v1295_v42, 0.0  ;;  %v1326_v57 = vmax.f32 %v1294_v43, 0.0  ;;  %v1008_v43 = vld [vmem:[%s3088_s0 + $0x190] sm:$0xff] }
 0x453   :  { %v1297_v47 = vadd.f32 %v1139_v44, %v994_v38  ;;  %v1252_v48 = vpop.f32.mrb[36].mxu1  ;;  %v1141_v49 = vpop.f32.mrb[37].mxu0  ;;  %v1328_v62 = vmax.f32 %v1296_v46, 0.0  ;;  %v1006_v38 = vld [vmem:[%s3088_s0 + $0x180] sm:$0xff] }
 0x454   :  { %v1299_v50 = vadd.f32 %v1252_v48, %v996_v40  ;;  %v1298_v51 = vadd.f32 %v1141_v49, %v995_v41  ;;  %v1254_v52 = vpop.f32.mrb[37].mxu1  ;;  %v1009_v49 = vld [vmem:[%s3088_s0 + $0x198] sm:$0xff] }
 0x455   :  { %v1329_v54 = vmax.f32 %v1297_v47, 0.0  ;;  %v1300_v55 = vadd.f32 %v1254_v52, %v997_v45  ;;  %v1007_v45 = vld [vmem:[%s3088_s0 + $0x188] sm:$0xff] }
 0x456   :  { %v1331_v58 = vmax.f32 %v1299_v50, 0.0  ;;  %v1330_v59 = vmax.f32 %v1298_v51, 0.0  ;;  %v1145_v61 = vpop.f32.mrb[38].mxu0  ;;  %v1010_v51 = vld [vmem:[%s3088_s0 + $0x1a0] sm:$0xff] }
 0x457   :  { %v2317_v63 = vpack.c.bf16 %v1329_v54, %v1325_v53  ;;  %v1332_v0 = vmax.f32 %v1300_v55, 0.0  ;;  %v1258_v2 = vpop.f32.mrb[38].mxu1  ;;  %v1147_v5 = vpop.f32.mrb[39].mxu0  ;;  %v1301_v12 = vadd.f32 %v1145_v61, %v998_v60  ;;  %v1012_v54 = vld [vmem:[%s3088_s0 + $0x1b0] sm:$0xff]  ;;  %v1011_v55 = vld [vmem:[%s3088_s0 + $0x1a8] sm:$0xff] }
 0x458   :  { %v2333_v6 = vpack.c.bf16 %v1331_v58, %v1327_v56  ;;  %v2315_v7 = vpack.c.bf16 %v1330_v59, %v1326_v57  ;;  %v1260_v9 = vpop.f32.mrb[39].mxu1  ;;  %v1303_v21 = vadd.f32 %v1258_v2, %v1000_v1  ;;  %v1302_v22 = vadd.f32 %v1147_v5, %v999_v3  ;;  %v1013_v59 = vld [vmem:[%s3088_s0 + $0x1b8] sm:$0xff] }
 0x459   :  { %v2331_v11 = vpack.c.bf16 %v1332_v0, %v1328_v62  ;;  %v1304_v24 = vadd.f32 %v1260_v9, %v1001_v8  ;;  %v1333_v31 = vmax.f32 %v1301_v12, 0.0 }
 0x45a   :  { %v1151_v18 = vpop.f32.mrb[40].mxu0  ;;  %2316 = vmatprep.subr.bf16.mxu0 %v2315_v7  ;;  %v1335_v34 = vmax.f32 %v1303_v21, 0.0  ;;  %v1334_v35 = vmax.f32 %v1302_v22, 0.0  ;;  %v1016_v22 = vld [vmem:[%s3088_s0 + $0x1d0] sm:$0xff] }
 0x45b   :  { %v1305_v25 = vadd.f32 %v1151_v18, %v1002_v10  ;;  %v1264_v26 = vpop.f32.mrb[40].mxu1  ;;  %2332 = vmatprep.subr.bf16.mxu1 %v2331_v11  ;;  %v1153_v27 = vpop.f32.mrb[41].mxu0  ;;  %2318 = vmatpush1.bf16.msra.mxu0 %v2317_v63  ;;  %v1336_v40 = vmax.f32 %v1304_v24, 0.0  ;;  %v1014_v11 = vld [vmem:[%s3088_s0 + $0x1c0] sm:$0xff] }
 0x45c   :  { %v1307_v28 = vadd.f32 %v1264_v26, %v1004_v13  ;;  %v1306_v29 = vadd.f32 %v1153_v27, %v1003_v14  ;;  %v1266_v30 = vpop.f32.mrb[41].mxu1  ;;  %2334 = vmatpush1.bf16.msra.mxu1 %v2333_v6  ;;  %v1017_v27 = vld [vmem:[%s3088_s0 + $0x1d8] sm:$0xff] }
 0x45d   :  { %v1337_v32 = vmax.f32 %v1305_v25, 0.0  ;;  %v1308_v33 = vadd.f32 %v1266_v30, %v1005_v23  ;;  %v1015_v23 = vld [vmem:[%s3088_s0 + $0x1c8] sm:$0xff] }
 0x45e   :  { %v1339_v36 = vmax.f32 %v1307_v28, 0.0  ;;  %v1338_v37 = vmax.f32 %v1306_v29, 0.0  ;;  %v1157_v39 = vpop.f32.mrb[42].mxu0  ;;  %v1018_v29 = vld [vmem:[%s3088_s0 + $0x1e0] sm:$0xff] }
 0x45f   :  { %v2321_v41 = vpack.c.bf16 %v1337_v32, %v1333_v31  ;;  %v1340_v42 = vmax.f32 %v1308_v33, 0.0  ;;  %v1270_v44 = vpop.f32.mrb[42].mxu1  ;;  %v1159_v46 = vpop.f32.mrb[43].mxu0  ;;  %v1309_v53 = vadd.f32 %v1157_v39, %v1006_v38  ;;  %v1020_v32 = vld [vmem:[%s3088_s0 + $0x1f0] sm:$0xff]  ;;  %v1019_v33 = vld [vmem:[%s3088_s0 + $0x1e8] sm:$0xff] }
 0x460   :  { %v2337_v47 = vpack.c.bf16 %v1339_v36, %v1335_v34  ;;  %v2319_v48 = vpack.c.bf16 %v1338_v37, %v1334_v35  ;;  %v1272_v50 = vpop.f32.mrb[43].mxu1  ;;  %v1311_v56 = vadd.f32 %v1270_v44, %v1008_v43  ;;  %v1310_v57 = vadd.f32 %v1159_v46, %v1007_v45  ;;  %v1021_v37 = vld [vmem:[%s3088_s0 + $0x1f8] sm:$0xff] }
 0x461   :  { %v2335_v52 = vpack.c.bf16 %v1340_v42, %v1336_v40  ;;  %v1312_v60 = vadd.f32 %v1272_v50, %v1009_v49  ;;  %v1341_v3 = vmax.f32 %v1309_v53, 0.0 }
 0x462   :  { %v1163_v58 = vpop.f32.mrb[44].mxu0  ;;  %2320 = vmatprep.subr.bf16.mxu0 %v2319_v48  ;;  %v1343_v7 = vmax.f32 %v1311_v56, 0.0  ;;  %v1342_v8 = vmax.f32 %v1310_v57, 0.0 }
 0x463   :  { %v1313_v61 = vadd.f32 %v1163_v58, %v1010_v51  ;;  %v1276_v62 = vpop.f32.mrb[44].mxu1  ;;  %2336 = vmatprep.subr.bf16.mxu1 %v2335_v52  ;;  %v1165_v63 = vpop.f32.mrb[45].mxu0  ;;  %2322 = vmatpush1.bf16.msra.mxu0 %v2321_v41  ;;  %v1344_v13 = vmax.f32 %v1312_v60, 0.0  ;;  %v2218_v58 = vld [vmem:[%s3089_s2 + $0x40] sm:$0xff]  ;;  %v2220_v60 = vld [vmem:[%s3089_s2 + $0x50] sm:$0xff] }
 0x464   :  { %v1315_v0 = vadd.f32 %v1276_v62, %v1012_v54  ;;  %v1314_v1 = vadd.f32 %v1165_v63, %v1011_v55  ;;  %v1278_v2 = vpop.f32.mrb[45].mxu1  ;;  %2338 = vmatpush1.bf16.msra.mxu1 %v2337_v47  ;;  %v2222_v62 = vld [vmem:[%s3089_s2 + $0x60] sm:$0xff]  ;;  %v2223_v63 = vld [vmem:[%s3089_s2 + $0x68] sm:$0xff] }
 0x465   :  { %v1345_v5 = vmax.f32 %v1313_v61, 0.0  ;;  %v1316_v6 = vadd.f32 %v1278_v2, %v1013_v59  ;;  %v2219_v59 = vld [vmem:[%s3089_s2 + $0x48] sm:$0xff]  ;;  %v2221_v61 = vld [vmem:[%s3089_s2 + $0x58] sm:$0xff] }
 0x466   :  { %v1347_v9 = vmax.f32 %v1315_v0, 0.0  ;;  %v1346_v10 = vmax.f32 %v1314_v1, 0.0  ;;  %v1169_v12 = vpop.f32.mrb[46].mxu0  ;;  %v2224_v0 = vld [vmem:[%s3089_s2 + $0x70] sm:$0xff]  ;;  %v2225_v1 = vld [vmem:[%s3089_s2 + $0x78] sm:$0xff] }
 0x467   :  { %v2325_v14 = vpack.c.bf16 %v1345_v5, %v1341_v3  ;;  %v1348_v21 = vmax.f32 %v1316_v6, 0.0  ;;  %v1282_v18 = vpop.f32.mrb[46].mxu1  ;;  %v1171_v24 = vpop.f32.mrb[47].mxu0  ;;  %v1317_v31 = vadd.f32 %v1169_v12, %v1014_v11 }
 0x468   :  { %v2341_v25 = vpack.c.bf16 %v1347_v9, %v1343_v7  ;;  %v2323_v26 = vpack.c.bf16 %v1346_v10, %v1342_v8  ;;  %v1284_v28 = vpop.f32.mrb[47].mxu1  ;;  %v1319_v34 = vadd.f32 %v1282_v18, %v1016_v22  ;;  %v1318_v35 = vadd.f32 %v1171_v24, %v1015_v23  ;;  %v1369_v6 = vpop.permute.xlu0 %1368 }
 0x469   :  { %v2339_v30 = vpack.c.bf16 %v1348_v21, %v1344_v13  ;;  %v1320_v38 = vadd.f32 %v1284_v28, %v1017_v27  ;;  %v1349_v45 = vmax.f32 %v1317_v31, 0.0  ;;  %v1374_v9 = vpop.permute.xlu1 %1373 }
 0x46a   :  { %v1175_v36 = vpop.f32.mrb[48].mxu0  ;;  %2324 = vmatprep.subr.bf16.mxu0 %v2323_v26  ;;  %v1351_v48 = vmax.f32 %v1319_v34, 0.0  ;;  %v1350_v49 = vmax.f32 %v1318_v35, 0.0 }
 0x46b   :  { %v1321_v39 = vadd.f32 %v1175_v36, %v1018_v29  ;;  %v1288_v40 = vpop.f32.mrb[48].mxu1  ;;  %2340 = vmatprep.subr.bf16.mxu1 %v2339_v30  ;;  %v1177_v41 = vpop.f32.mrb[49].mxu0  ;;  %2326 = vmatpush1.bf16.msra.mxu0 %v2325_v14  ;;  %v1352_v52 = vmax.f32 %v1320_v38, 0.0 }
 0x46c   :  { %v1323_v42 = vadd.f32 %v1288_v40, %v1020_v32  ;;  %v1322_v43 = vadd.f32 %v1177_v41, %v1019_v33  ;;  %v1290_v44 = vpop.f32.mrb[49].mxu1  ;;  %2342 = vmatpush1.bf16.msra.mxu1 %v2341_v25 }
 0x46d   :  { %v1353_v46 = vmax.f32 %v1321_v39, 0.0  ;;  %v1324_v47 = vadd.f32 %v1290_v44, %v1021_v37  ;;  %v1379_v37 = vpop.permute.xlu0 %1378 }
 0x46e   :  { %v1355_v50 = vmax.f32 %v1323_v42, 0.0  ;;  %v1354_v51 = vmax.f32 %v1322_v43, 0.0  ;;  %v1384_v43 = vpop.permute.xlu1 %1383 }
 0x46f   :  { %v2329_v53 = vpack.c.bf16 %v1353_v46, %v1349_v45  ;;  %v1356_v54 = vmax.f32 %v1324_v47, 0.0 }
 0x470   :  { %v2345_v55 = vpack.c.bf16 %v1355_v50, %v1351_v48  ;;  %v2327_v56 = vpack.c.bf16 %v1354_v51, %v1350_v49 }
 0x471   :  { %v2343_v57 = vpack.c.bf16 %v1356_v54, %v1352_v52 }
 0x472   :  { %2328 = vmatprep.subr.bf16.mxu0 %v2327_v56 }
 0x473   :  { %2344 = vmatprep.subr.bf16.mxu1 %v2343_v57  ;;  %2330 = vmatpush1.bf16.msra.mxu0 %v2329_v53 }
 0x474   :  { %2346 = vmatpush1.bf16.msra.mxu1 %v2345_v55 }
 0x476   :  { %2226 = vmatmul.mubr.msk.f32.vlgmr.msra.gmra.mrb[50].mxu0 %vm465_vm2, %v2218_v58 }
 0x477   :  { %2234 = vmatmul.mubr.msk.f32.vlgmr.msra.gmra.mrb[50].mxu1 %vm465_vm2, %v2218_v58  ;;  %1500 = vmatprep.mubr.f32.mxu0 %v2403_v4 }
 0x478   :  { %1613 = vmatprep.mubr.f32.mxu1 %v2403_v4 }
 0x47a   :  { %2227 = vmatmul.mubr.msk.f32.gmra.mrb[52].mxu0 %vm465_vm2, %v2219_v59 }
 0x47b   :  { %2235 = vmatmul.mubr.msk.f32.gmra.mrb[52].mxu1 %vm465_vm2, %v2219_v59  ;;  %1506 = vmatprep.mubr.f32.mxu0 %v2403_v4 }
 0x47c   :  { %1619 = vmatprep.mubr.f32.mxu1 %v2403_v4 }
 0x47e   :  { %2228 = vmatmul.mubr.msk.f32.gmra.mrb[54].mxu0 %vm465_vm2, %v2220_v60 }
 0x47f   :  { %2236 = vmatmul.mubr.msk.f32.gmra.mrb[54].mxu1 %vm465_vm2, %v2220_v60  ;;  %1512 = vmatprep.mubr.f32.mxu0 %v2403_v4 }
 0x480   :  { %1625 = vmatprep.mubr.f32.mxu1 %v2403_v4 }
 0x482   :  { %2229 = vmatmul.mubr.msk.f32.gmra.mrb[56].mxu0 %vm465_vm2, %v2221_v61 }
 0x483   :  { %2237 = vmatmul.mubr.msk.f32.gmra.mrb[56].mxu1 %vm465_vm2, %v2221_v61  ;;  %1518 = vmatprep.mubr.f32.mxu0 %v2403_v4 }
 0x484   :  { %1631 = vmatprep.mubr.f32.mxu1 %v2403_v4 }
 0x486   :  { %2230 = vmatmul.mubr.msk.f32.gmra.mrb[58].mxu0 %vm465_vm2, %v2222_v62 }
 0x487   :  { %2238 = vmatmul.mubr.msk.f32.gmra.mrb[58].mxu1 %vm465_vm2, %v2222_v62  ;;  %1524 = vmatprep.mubr.f32.mxu0 %v2403_v4 }
 0x488   :  { %1637 = vmatprep.mubr.f32.mxu1 %v2403_v4 }
 0x48a   :  { %2231 = vmatmul.mubr.msk.f32.gmra.mrb[60].mxu0 %vm465_vm2, %v2223_v63 }
 0x48b   :  { %2239 = vmatmul.mubr.msk.f32.gmra.mrb[60].mxu1 %vm465_vm2, %v2223_v63  ;;  %1530 = vmatprep.mubr.f32.mxu0 %v2403_v4 }
 0x48c   :  { %1643 = vmatprep.mubr.f32.mxu1 %v2403_v4 }
 0x48e   :  { %2232 = vmatmul.mubr.msk.f32.gmra.mrb[62].mxu0 %vm465_vm2, %v2224_v0 }
 0x48f   :  { %2240 = vmatmul.mubr.msk.f32.gmra.mrb[62].mxu1 %vm465_vm2, %v2224_v0  ;;  %1536 = vmatprep.mubr.f32.mxu0 %v2403_v4 }
 0x490   :  { %1649 = vmatprep.mubr.f32.mxu1 %v2403_v4 }
 0x492   :  { %2233 = vmatmul.mubr.msk.f32.gmra.mrb[64].mxu0 %vm465_vm2, %v2225_v1 }
 0x493   :  { %2241 = vmatmul.mubr.msk.f32.gmra.mrb[64].mxu1 %vm465_vm2, %v2225_v1  ;;  %1762 = vmatprep.mubr.f32.mxu0 %v2403_v4 }
 0x494   :  { %1833 = vmatprep.mubr.f32.mxu1 %v2403_v4 }
 0x549   :  { %v1496_v2 = vpop.f32.mrb[50].mxu0 }
 0x54a   :  { %v1609_v3 = vpop.f32.mrb[50].mxu1  ;;  %v1498_v5 = vpop.f32.mrb[51].mxu0  ;;  %v1497_v8 = vadd.f32 %v1496_v2, %v1369_v6 }
 0x54b   :  { %v1611_v7 = vpop.f32.mrb[51].mxu1  ;;  %v1610_v10 = vadd.f32 %v1609_v3, %v1369_v6  ;;  %v1499_v11 = vadd.f32 %v1498_v5, %v1369_v6  ;;  %v1389_v3 = vpop.permute.xlu0 %1388 }
 0x54c   :  { %v1612_v13 = vadd.f32 %v1611_v7, %v1369_v6  ;;  %v1656_v25 = vmax.f32 %v1497_v8, 0.0 }
 0x54d   :  { %v1502_v12 = vpop.f32.mrb[52].mxu0  ;;  %v1658_v27 = vmax.f32 %v1610_v10, 0.0  ;;  %v1657_v28 = vmax.f32 %v1499_v11, 0.0  ;;  %v1394_v10 = vpop.permute.xlu1 %1393 }
 0x54e   :  { %v1503_v14 = vadd.f32 %v1502_v12, %v1374_v9  ;;  %v1615_v21 = vpop.f32.mrb[52].mxu1  ;;  %v1504_v22 = vpop.f32.mrb[53].mxu0  ;;  %v1659_v32 = vmax.f32 %v1612_v13, 0.0 }
 0x54f   :  { %v1616_v18 = vadd.f32 %v1615_v21, %v1374_v9  ;;  %v1505_v23 = vadd.f32 %v1504_v22, %v1374_v9  ;;  %v1617_v24 = vpop.f32.mrb[53].mxu1 }
 0x550   :  { %v1660_v26 = vmax.f32 %v1503_v14, 0.0  ;;  %v1618_v4 = vadd.f32 %v1617_v24, %v1374_v9 }
 0x551   :  { %v1662_v29 = vmax.f32 %v1616_v18, 0.0  ;;  %v1661_v30 = vmax.f32 %v1505_v23, 0.0  ;;  %v1508_v31 = vpop.f32.mrb[54].mxu0 }
 0x552   :  { %v2349_v33 = vpack.c.bf16 %v1660_v26, %v1656_v25  ;;  %v1663_v34 = vmax.f32 %v1618_v4, 0.0  ;;  %v1621_v35 = vpop.f32.mrb[54].mxu1  ;;  %v1510_v36 = vpop.f32.mrb[55].mxu0  ;;  %v1509_v42 = vadd.f32 %v1508_v31, %v1379_v37 }
 0x553   :  { %v2365_v38 = vpack.c.bf16 %v1662_v29, %v1658_v27  ;;  %v2347_v39 = vpack.c.bf16 %v1661_v30, %v1657_v28  ;;  %v1623_v40 = vpop.f32.mrb[55].mxu1  ;;  %v1622_v44 = vadd.f32 %v1621_v35, %v1379_v37  ;;  %v1511_v45 = vadd.f32 %v1510_v36, %v1379_v37 }
 0x554   :  { %v2363_v41 = vpack.c.bf16 %v1663_v34, %v1659_v32  ;;  %v1624_v47 = vadd.f32 %v1623_v40, %v1379_v37  ;;  %v1664_v54 = vmax.f32 %v1509_v42, 0.0 }
 0x555   :  { %v1514_v46 = vpop.f32.mrb[56].mxu0  ;;  %2348 = vmatprep.subr.bf16.mxu0 %v2347_v39  ;;  %v1666_v57 = vmax.f32 %v1622_v44, 0.0  ;;  %v1665_v58 = vmax.f32 %v1511_v45, 0.0  ;;  %v1404_v44 = vpop.permute.xlu1 %1403 }
 0x556   :  { %v1515_v48 = vadd.f32 %v1514_v46, %v1384_v43  ;;  %v1627_v49 = vpop.f32.mrb[56].mxu1  ;;  %2364 = vmatprep.subr.bf16.mxu1 %v2363_v41  ;;  %v1516_v50 = vpop.f32.mrb[57].mxu0  ;;  %2350 = vmatpush1.bf16.msra.mxu0 %v2349_v33  ;;  %v1667_v62 = vmax.f32 %v1624_v47, 0.0 }
 0x557   :  { %v1628_v51 = vadd.f32 %v1627_v49, %v1384_v43  ;;  %v1517_v52 = vadd.f32 %v1516_v50, %v1384_v43  ;;  %v1629_v53 = vpop.f32.mrb[57].mxu1  ;;  %2366 = vmatpush1.bf16.msra.mxu1 %v2365_v38  ;;  %v1399_v38 = vpop.permute.xlu0 %1398 }
 0x558   :  { %v1668_v55 = vmax.f32 %v1515_v48, 0.0  ;;  %v1630_v56 = vadd.f32 %v1629_v53, %v1384_v43 }
 0x559   :  { %v1670_v59 = vmax.f32 %v1628_v51, 0.0  ;;  %v1669_v60 = vmax.f32 %v1517_v52, 0.0  ;;  %v1520_v61 = vpop.f32.mrb[58].mxu0 }
 0x55a   :  { %v2353_v63 = vpack.c.bf16 %v1668_v55, %v1664_v54  ;;  %v1671_v0 = vmax.f32 %v1630_v56, 0.0  ;;  %v1633_v1 = vpop.f32.mrb[58].mxu1  ;;  %v1522_v2 = vpop.f32.mrb[59].mxu0  ;;  %v1521_v9 = vadd.f32 %v1520_v61, %v1389_v3 }
 0x55b   :  { %v2369_v5 = vpack.c.bf16 %v1670_v59, %v1666_v57  ;;  %v2351_v6 = vpack.c.bf16 %v1669_v60, %v1665_v58  ;;  %v1635_v7 = vpop.f32.mrb[59].mxu1  ;;  %v1634_v11 = vadd.f32 %v1633_v1, %v1389_v3  ;;  %v1523_v12 = vadd.f32 %v1522_v2, %v1389_v3 }
 0x55c   :  { %v2367_v8 = vpack.c.bf16 %v1671_v0, %v1667_v62  ;;  %v1636_v14 = vadd.f32 %v1635_v7, %v1389_v3  ;;  %v1672_v26 = vmax.f32 %v1521_v9, 0.0 }
 0x55d   :  { %v1526_v13 = vpop.f32.mrb[60].mxu0  ;;  %2352 = vmatprep.subr.bf16.mxu0 %v2351_v6  ;;  %v1674_v28 = vmax.f32 %v1634_v11, 0.0  ;;  %v1673_v29 = vmax.f32 %v1523_v12, 0.0  ;;  %v1693_v6 = vpop.permute.xlu0 %1692 }
 0x55e   :  { %v1527_v21 = vadd.f32 %v1526_v13, %v1394_v10  ;;  %v1639_v22 = vpop.f32.mrb[60].mxu1  ;;  %2368 = vmatprep.subr.bf16.mxu1 %v2367_v8  ;;  %v1528_v18 = vpop.f32.mrb[61].mxu0  ;;  %2354 = vmatpush1.bf16.msra.mxu0 %v2353_v63  ;;  %v1675_v33 = vmax.f32 %v1636_v14, 0.0 }
 0x55f   :  { %v1640_v23 = vadd.f32 %v1639_v22, %v1394_v10  ;;  %v1529_v24 = vadd.f32 %v1528_v18, %v1394_v10  ;;  %v1641_v25 = vpop.f32.mrb[61].mxu1  ;;  %2370 = vmatpush1.bf16.msra.mxu1 %v2369_v5  ;;  %v2242_v5 = vld [vmem:[%s3090_s3 + $0x8] sm:$0xff] }
 0x560   :  { %v1676_v4 = vmax.f32 %v1527_v21, 0.0  ;;  %v1642_v27 = vadd.f32 %v1641_v25, %v1394_v10 }
 0x561   :  { %v1678_v30 = vmax.f32 %v1640_v23, 0.0  ;;  %v1677_v31 = vmax.f32 %v1529_v24, 0.0  ;;  %v1532_v32 = vpop.f32.mrb[62].mxu0 }
 0x562   :  { %v2357_v34 = vpack.c.bf16 %v1676_v4, %v1672_v26  ;;  %v1679_v35 = vmax.f32 %v1642_v27, 0.0  ;;  %v1645_v36 = vpop.f32.mrb[62].mxu1  ;;  %v1534_v37 = vpop.f32.mrb[63].mxu0  ;;  %v1533_v43 = vadd.f32 %v1532_v32, %v1399_v38 }
 0x563   :  { %v2373_v39 = vpack.c.bf16 %v1678_v30, %v1674_v28  ;;  %v2355_v40 = vpack.c.bf16 %v1677_v31, %v1673_v29  ;;  %v1647_v41 = vpop.f32.mrb[63].mxu1  ;;  %v1646_v45 = vadd.f32 %v1645_v36, %v1399_v38  ;;  %v1535_v46 = vadd.f32 %v1534_v37, %v1399_v38 }
 0x564   :  { %v2371_v42 = vpack.c.bf16 %v1679_v35, %v1675_v33  ;;  %v1648_v48 = vadd.f32 %v1647_v41, %v1399_v38  ;;  %v1680_v55 = vmax.f32 %v1533_v43, 0.0 }
 0x565   :  { %v1538_v47 = vpop.f32.mrb[64].mxu0  ;;  %2356 = vmatprep.subr.bf16.mxu0 %v2355_v40  ;;  %v1682_v58 = vmax.f32 %v1646_v45, 0.0  ;;  %v1681_v59 = vmax.f32 %v1535_v46, 0.0  ;;  %v2992_v45 = vld [vmem:[%s3088_s0 + $0x200] sm:$0xff]  ;;  %v2997_v46 = vld [vmem:[%s3088_s0 + $0x208] sm:$0xff] }
 0x566   :  { %v1539_v49 = vadd.f32 %v1538_v47, %v1404_v44  ;;  %v1651_v50 = vpop.f32.mrb[64].mxu1  ;;  %2372 = vmatprep.subr.bf16.mxu1 %v2371_v42  ;;  %v1540_v51 = vpop.f32.mrb[65].mxu0  ;;  %2358 = vmatpush1.bf16.msra.mxu0 %v2357_v34  ;;  %v1683_v62 = vmax.f32 %v1648_v48, 0.0 }
 0x567   :  { %v1652_v52 = vadd.f32 %v1651_v50, %v1404_v44  ;;  %v1541_v53 = vadd.f32 %v1540_v51, %v1404_v44  ;;  %v1653_v54 = vpop.f32.mrb[65].mxu1  ;;  %2374 = vmatpush1.bf16.msra.mxu1 %v2373_v39 }
 0x568   :  { %v1684_v56 = vmax.f32 %v1539_v49, 0.0  ;;  %v1654_v57 = vadd.f32 %v1653_v54, %v1404_v44  ;;  %v1884_v44 = vpop.permute.xlu1 %1883  ;;  %v3007_v49 = vld [vmem:[%s3088_s0 + $0x218] sm:$0xff]  ;;  %v1928_v54 = vsub.s32 0, %v2472_v17 }
 0x569   :  { %v1686_v60 = vmax.f32 %v1652_v52, 0.0  ;;  %v1685_v61 = vmax.f32 %v1541_v53, 0.0  ;;  %v1918_v53 = vcombine.low %v2992_v45, %v2997_v46 }
 0x56a   :  { %v2361_v63 = vpack.c.bf16 %v1684_v56, %v1680_v55  ;;  %v1687_v0 = vmax.f32 %v1654_v57, 0.0 }
 0x56b   :  { %v2377_v1 = vpack.c.bf16 %v1686_v60, %v1682_v58  ;;  %v2359_v2 = vpack.c.bf16 %v1685_v61, %v1681_v59  ;;  %v1932_v58 = vsub.s32 4, %v2472_v17  ;;  %v3017_v59 = vsub.s32 1, %v2472_v17 }
 0x56c   :  { %v2375_v3 = vpack.c.bf16 %v1687_v0, %v1683_v62  ;;  %v2005_v60 = vsub.s32 5, %v2472_v17  ;;  %v3021_v61 = vsub.s32 2, %v2472_v17  ;;  %v2061_v62 = vsub.s32 6, %v2472_v17 }
 0x56d   :  { %2360 = vmatprep.subr.bf16.mxu0 %v2359_v2 }
 0x56e   :  { %2376 = vmatprep.subr.bf16.mxu1 %v2375_v3  ;;  %2362 = vmatpush1.bf16.msra.mxu0 %v2361_v63 }
 0x56f   :  { %2378 = vmatpush1.bf16.msra.mxu1 %v2377_v1 }
 0x571   :  { %2243 = vmatmul.mubr.msk.f32.vlgmr.msra.gmra.mrb[66].mxu0 %vm465_vm2, %v2242_v5 }
 0x572   :  { %2244 = vmatmul.mubr.msk.f32.vlgmr.msra.gmra.mrb[66].mxu1 %vm465_vm2, %v2242_v5 }
 0x644   :  { %v1764_v7 = vpop.f32.mrb[66].mxu0 }
 0x645   :  { %v1765_v8 = vadd.f32 %v1764_v7, %v1693_v6  ;;  %v1835_v9 = vpop.f32.mrb[66].mxu1  ;;  %v1766_v10 = vpop.f32.mrb[67].mxu0  ;;  %v1911_v7 = vld [vmem:[%s3088_s0 + $0x228] sm:$0x7f] }
 0x646   :  { %v1836_v11 = vadd.f32 %v1835_v9, %v1693_v6  ;;  %v1767_v12 = vadd.f32 %v1766_v10, %v1693_v6  ;;  %v1837_v13 = vpop.f32.mrb[67].mxu1 }
 0x647   :  { %v2245_v14 = vclamps-f32 %v1765_v8, 10.0  ;;  %v1838_v21 = vadd.f32 %v1837_v13, %v1693_v6  ;;  %v1910_v6 = vld [vmem:[%s3088_s0 + $0x220] sm:$0x7f] }
 0x648   :  { %v2247_v22 = vclamps-f32 %v1836_v11, 10.0  ;;  %v2246_v18 = vclamps-f32 %v1767_v12, 10.0  ;;  %v1853_v23 = vcombine.high %v1765_v8, %v1767_v12 }
 0x649   :  { %v1859_v24 = vsub.f32 0.0, %v2245_v14  ;;  %v2248_v25 = vclamps-f32 %v1838_v21, 10.0  ;;  %v1854_v26 = vcombine.high %v1836_v11, %v1838_v21 }
 0x64a   :  { %v1861_v4 = vsub.f32 0.0, %v2247_v22  ;;  %v1860_v27 = vsub.f32 0.0, %v2246_v18  ;;  %v1857_v37 = vsub.f32 %v2753_v19, %v1853_v23 }
 0x64b   :  { %v1863_v28 = vmul.f32 1.442695, %v1859_v24  ;;  %v1862_v29 = vsub.f32 0.0, %v2248_v25  ;;  %v1858_v39 = vsub.f32 %v2756_v20, %v1854_v26  ;;  %v3002_v20 = vld [vmem:[%s3088_s0 + $0x210] sm:$0xff] }
 0x64c   :  { %v1867_v30 = vmul.f32 1.442695, %v1861_v4  ;;  %v1865_v31 = vmul.f32 1.442695, %v1860_v27  ;;  %v1919_v56 = vcombine.low %v3002_v20, %v3007_v49 }
 0x64d   :  { %2394 = vpow2.f32 %v1863_v28  ;;  %v1869_v32 = vmul.f32 1.442695, %v1862_v29 }
 0x64e   :  { %2396 = vpow2.f32 %v1867_v30  ;;  %v1912_v30 = vld [vmem:[%s3088_s0 + $0x230] sm:$0x7f] }
 0x64f   :  { %2398 = vpow2.f32 %v1865_v31 }
 0x650   :  { %2400 = vpow2.f32 %v1869_v32 }
 0x657   :  { %v2395_v33 = vpop.eup %2394 }
 0x658   :  { %v2397_v34 = vpop.eup %2396 }
 0x659   :  { %v2399_v35 = vpop.eup %2398 }
 0x65a   :  { %v2401_v36 = vpop.eup %2400  ;;  %v1875_v38 = vcombine.low %v2395_v33, %v2399_v35  ;;  %v1913_v35 = vld [vmem:[%s3088_s0 + $0x238] sm:$0x7f] }
 0x65b   :  { %v1876_v40 = vcombine.low %v2397_v34, %v2401_v36 }
 0x65c   :  { %v1879_v41 = vmul.f32 %v1875_v38, %v1857_v37 }
 0x65d   :  { %v1880_v42 = vmul.f32 %v1876_v40, %v1858_v39 }
 0x65e   :  { %v1888_v43 = vcombine.high %v1879_v41, %v1879_v41  ;;  %v1892_v19 = vmul.f32 %v1884_v44, %v1879_v41 }
 0x65f   :  { %v1889_v47 = vcombine.high %v1880_v42, %v1880_v42  ;;  %v1894_v50 = vmul.f32 %v1884_v44, %v1880_v42 }
 0x660   :  { %v1893_v48 = vmul.f32 %v1888_v43, %v1884_v44 }
 0x661   :  { %v1895_v51 = vmul.f32 %v1889_v47, %v1884_v44 }
 0x662   :  { %v1900_v52 = vcombine.low %v1892_v19, %v1893_v48 }
 0x663   :  { %v1901_v55 = vcombine.low %v1894_v50, %v1895_v51 }
 0x664   :  { %v1904_v57 = vadd.f32 %v1900_v52, %v2759_v15 }
 0x665   :  { %v1905_v63 = vadd.f32 %v1901_v55, %v2762_v16 }
 0x666   :  { %v1922_v0 = vmul.f32 %v1918_v53, %v1904_v57 }
 0x667   :  { %v3025_v1 = vmul.f32 %v1919_v56, %v1905_v63 }
 0x668   :  { %v1929_v2 = vrot.slane %v1922_v0, %v1928_v54  ;;  %v1933_v15 = vrot.slane %v1922_v0, %v1932_v58  ;;  %v2002_v3 = vrot.slane %v1922_v0, %v3017_v59  ;;  %v2006_v5 = vrot.slane %v1922_v0, %v2005_v60 }
 0x669   :  { %v2058_v17 = vrot.slane %v1922_v0, %v3021_v61  ;;  %v2062_v16 = vrot.slane %v1922_v0, %v2061_v62  ;;  %v1937_v8 = vrot.slane %v3025_v1, %v1928_v54  ;;  %v1941_v9 = vrot.slane %v3025_v1, %v1932_v58 }
 0x66a   :  { %v1949_v10 = vrot.slane %v1929_v2, %v1928_v54  ;;  %v1953_v11 = vrot.slane %v1933_v15, %v1928_v54  ;;  %v2022_v12 = vrot.slane %v2002_v3, %v3017_v59  ;;  %v2026_v13 = vrot.slane %v2006_v5, %v3017_v59 }
 0x66b   :  { %v2078_v14 = vrot.slane %v2058_v17, %v3021_v61  ;;  %v2082_v21 = vrot.slane %v2062_v16, %v3021_v61  ;;  %v1957_v22 = vrot.slane %v1937_v8, %v1928_v54  ;;  %v1961_v18 = vrot.slane %v1941_v9, %v1928_v54 }
 0x66c   :  { %v1962_v23 = vmul.f32 %v1949_v10, %v2992_v45  ;;  %v1963_v24 = vmul.f32 %v1953_v11, %v2997_v46  ;;  %v1966_v25 = vmul.f32 %v1949_v10, %v1910_v6  ;;  %v1967_v26 = vmul.f32 %v1953_v11, %v1911_v7 }
 0x66d   :  { %v2035_v4 = vmul.f32 %v2022_v12, %v1910_v6  ;;  %v2036_v27 = vmul.f32 %v2026_v13, %v1911_v7  ;;  %v2091_v28 = vmul.f32 %v2078_v14, %v1910_v6  ;;  %v2092_v29 = vmul.f32 %v2082_v21, %v1911_v7 }
 0x66e   :  { %v1979_v31 = vrot.slane %v1962_v23, 3  ;;  %v1980_v32 = vrot.slane %v1966_v25, 3  ;;  %v1982_v33 = vrot.slane %v1963_v24, 3  ;;  %v1983_v34 = vrot.slane %v1967_v26, 3 }
 0x66f   :  { %v2043_v36 = vrot.slane %v2035_v4, 6  ;;  %v2044_v37 = vrot.slane %v2036_v27, 6  ;;  %v2099_v38 = vrot.slane %v2091_v28, 1  ;;  %v2100_v39 = vrot.slane %v2092_v29, 1 }
 0x670   :  { %v1981_v40 = vsel %vm1978_vm3, %v1979_v31, %v1980_v32  ;;  %v1984_v41 = vsel %vm1978_vm3, %v1982_v33, %v1983_v34  ;;  %v1964_v42 = vmul.f32 %v1957_v22, %v3002_v20  ;;  %v1965_v43 = vmul.f32 %v1961_v18, %v3007_v49 }
 0x671   :  { %v1995_v44 = vadd.f32 %v1981_v40, %v2992_v45  ;;  %v1996_v47 = vadd.f32 %v1984_v41, %v2997_v46  ;;  %v1968_v19 = vmul.f32 %v1957_v22, %v1912_v30  ;;  %v1969_v48 = vmul.f32 %v1961_v18, %v1913_v35 }
 0x672   :  { %v1985_v50 = vrot.slane %v1964_v42, 3  ;;  %v1988_v51 = vrot.slane %v1965_v43, 3  ;;  %v2010_v52 = vrot.slane %v3025_v1, %v3017_v59  ;;  %v2014_v53 = vrot.slane %v3025_v1, %v2005_v60 }
 0x673   :  { %v2051_v54 = vadd.f32 %v2043_v36, %v1995_v44  ;;  %v2052_v55 = vadd.f32 %v2044_v37, %v1996_v47  ;;  %v1986_v56 = vrot.slane %v1968_v19, 3  ;;  %v1989_v57 = vrot.slane %v1969_v48, 3 }
 0x674   :  { %v2030_v58 = vrot.slane %v2010_v52, %v3017_v59  ;;  %v2034_v63 = vrot.slane %v2014_v53, %v3017_v59  ;;  %v2066_v45 = vrot.slane %v3025_v1, %v3021_v61  ;;  %v2070_v46 = vrot.slane %v3025_v1, %v2061_v62 }
 0x675   :  { %v2107_v0 = vadd.f32 %v2099_v38, %v2051_v54  ;;  %v2108_v2 = vadd.f32 %v2100_v39, %v2052_v55  ;;  %v1987_v15 = vsel %vm1978_vm3, %v1985_v50, %v1986_v56  ;;  %v1990_v3 = vsel %vm1978_vm3, %v1988_v51, %v1989_v57 }
 0x676   :  { %v1997_v60 = vadd.f32 %v1987_v15, %v3002_v20  ;;  %v1998_v5 = vadd.f32 %v1990_v3, %v3007_v49  ;;  %v2037_v6 = vmul.f32 %v2030_v58, %v1912_v30  ;;  %v2038_v7 = vmul.f32 %v2034_v63, %v1913_v35 }
 0x677   :  { %v2115_v17 = vcombine.low %v2107_v0, %v2108_v2  ;;  %v2116_v16 = vcombine.high %v2107_v0, %v2108_v2  ;;  %v2086_v59 = vrot.slane %v2066_v45, %v3021_v61  ;;  %v2090_v8 = vrot.slane %v2070_v46, %v3021_v61 }
 0x678   :  { %v2045_v1 = vrot.slane %v2037_v6, 6  ;;  %v2046_v9 = vrot.slane %v2038_v7, 6 }
 0x679   :  { %v2249_v10 = vrot.slane %v2115_v17, 11  ;;  %v2124_v20 = vrot.slane %v2116_v16, 7  ;;  %v2093_v11 = vmul.f32 %v2086_v59, %v1912_v30  ;;  %v2094_v49 = vmul.f32 %v2090_v8, %v1913_v35 }
 0x67a   :  { %v2053_v12 = vadd.f32 %v2045_v1, %v1997_v60  ;;  %v2054_v13 = vadd.f32 %v2046_v9, %v1998_v5 }
 0x67b   :  { %v2125_v14 = vsel %vm3071_vm6, %v2249_v10, %v2124_v20  ;;  %v2101_v21 = vrot.slane %v2093_v11, 1  ;;  %v2102_v22 = vrot.slane %v2094_v49, 1 }
 0x67c   :  { %2132 = vst [vmem:[%s3091_s6] sm:$0x77] %v2125_v14 }
 0x67d   :  { %v2109_v61 = vadd.f32 %v2101_v21, %v2053_v12  ;;  %v2110_v18 = vadd.f32 %v2102_v22, %v2054_v13 }
 0x67f   :  { %v2117_v23 = vcombine.low %v2109_v61, %v2110_v18  ;;  %v2118_v24 = vcombine.high %v2109_v61, %v2110_v18 }
 0x681   :  { %v2250_v25 = vrot.slane %v2117_v23, 11  ;;  %v2128_v26 = vrot.slane %v2118_v24, 7 }
 0x683   :  { %v2129_v4 = vsel %vm3071_vm6, %v2250_v25, %v2128_v26 }
 0x684   :  { %2133 = vst [vmem:[%s3091_s6 + $0x8] sm:$0x77] %v2129_v4 }

</bundles_post_ra>
